<compile_context>
chip_gen: v6e
topology: v6e:2x2x1
jax: 0.10.0
libtpu: 0.0.40
codegen_flags: <defaults>
</compile_context>

<pallas_src>
import functools

import jax
import jax.numpy as jnp
from jax.experimental import pallas as pl
from jax.experimental.pallas import tpu as pltpu


def _sepconv_kernel(x_ref, wdw_ref, bdw_ref, wpw_ref, bpw_ref, o_ref, *,
                    K, dilation, TH, W_out, halo_tiled):
    """One grid step: output rows [h*TH, (h+1)*TH) of batch element n.

    x_ref   : (1, TH+halo, Wp, C_in)  halo row window    (halo_tiled=True)
              (1, Hp,      Wp, C_in)  full padded image  (halo_tiled=False)
    wdw_ref : (K*K, 1, C_in)          depthwise taps, tap-major
    bdw_ref : (1, C_in)
    wpw_ref : (C_in, C_out)           pointwise weights
    bpw_ref : (1, C_out)
    o_ref   : (1, TH*W_out, C_out)    flattened-row output tile
    """
    halo = (K - 1) * dilation
    c_in = x_ref.shape[-1]

    if halo_tiled:
        xw = x_ref[0]                                            # (TH+halo, Wp, C)
    else:
        row0 = pl.program_id(1) * TH
        xw = x_ref[0, pl.ds(row0, TH + halo), :, :]
    xw = xw.astype(jnp.float32)

    # Hoist taps & depthwise bias out of the accumulation loops (loaded once).
    taps = wdw_ref[...].astype(jnp.float32)                      # (K*K, 1, C_in)
    bdw = bdw_ref[...].astype(jnp.float32)                       # (1, C_in)

    # Depthwise KxK conv, vectorized over all TH rows on the VPU (f32 accumulate).
    # Only K shifted column views of the halo window (not TH*K*K row loads).
    acc = jnp.zeros((TH, W_out, c_in), jnp.float32)
    for kw in range(K):
        cols = xw[:, kw * dilation:kw * dilation + W_out, :]     # (TH+halo, W_out, C)
        for kh in range(K):
            rows = cols[kh * dilation:kh * dilation + TH]        # (TH, W_out, C)
            acc = acc + rows * taps[kh * K + kw]
    a = jnp.maximum(acc + bdw, 0.0)                              # ReLU act_layer

    # Pointwise 1x1 conv: one MXU matmul at default precision (f32 accumulate).
    y = jnp.dot(a.reshape(TH * W_out, c_in),
                wpw_ref[...].astype(jnp.float32),
                preferred_element_type=jnp.float32)
    y = y + bpw_ref[...].astype(jnp.float32)
    o_ref[0] = y.astype(o_ref.dtype)


def _pick_row_tile(h_out, w_out, *, target_m=1024, max_rows=None):
    """Largest divisor TH of h_out with TH*w_out <= target_m and a sublane-aligned
    flattened row tile; falls back to the smallest legal divisor / full height."""
    cap = h_out if max_rows is None else max(1, min(h_out, max_rows))
    best = None
    for th in range(1, cap + 1):
        if h_out % th:
            continue
        if (th * w_out) % 8 != 0 and th != h_out:
            continue  # keep the (TH*W_out, C_out) output store sublane-aligned
        if best is None or th * w_out <= target_m:
            best = th
    return best if best is not None else h_out


def _build_sepconv_call(N, C_in, C_out, Hp, Wp, H_out, W_out, K, dilation, TH,
                        out_dtype, halo_tiled):
    halo = (K - 1) * dilation
    num_h = H_out // TH
    kernel = functools.partial(_sepconv_kernel, K=K, dilation=dilation,
                               TH=TH, W_out=W_out, halo_tiled=halo_tiled)

    if halo_tiled:
        # Halo row window: the H dim is element-indexed so consecutive row tiles
        # overlap by `halo` rows; only O(TH) input rows live in VMEM per step.
        x_spec = pl.BlockSpec((1, pl.Element(TH + halo), Wp, C_in),
                              lambda n, h: (n, h * TH, 0, 0))
        x_rows = TH + halo
    else:
        # Fallback: whole padded image of batch n resident (small images only).
        x_spec = pl.BlockSpec((1, Hp, Wp, C_in), lambda n, h: (n, 0, 0, 0))
        x_rows = Hp

    # Explicit scoped-VMEM budget (double-buffered blocks + weights + f32 temps).
    itemsize = jnp.dtype(out_dtype).itemsize
    x_blk = x_rows * Wp * C_in * 4
    o_blk = TH * W_out * C_out * itemsize
    w_blk = (K * K * C_in + C_in + C_in * C_out + C_out) * 4
    temps = (TH + halo) * Wp * C_in * 4 + 3 * TH * W_out * max(C_in, C_out) * 4
    est = 2 * (x_blk + o_blk) + 2 * w_blk + temps
    vmem_limit = int(min(max(2 * est, 32 << 20), 100 << 20))

    return pl.pallas_call(
        kernel,
        out_shape=jax.ShapeDtypeStruct((N, H_out * W_out, C_out), out_dtype),
        grid_spec=pltpu.PrefetchScalarGridSpec(
            num_scalar_prefetch=0,
            grid=(N, num_h),
            in_specs=[
                x_spec,
                # Weights/biases: constant block index -> DMA'd once and reused.
                pl.BlockSpec((K * K, 1, C_in), lambda n, h: (0, 0, 0)),
                pl.BlockSpec((1, C_in), lambda n, h: (0, 0)),
                pl.BlockSpec((C_in, C_out), lambda n, h: (0, 0)),
                pl.BlockSpec((1, C_out), lambda n, h: (0, 0)),
            ],
            out_specs=pl.BlockSpec((1, TH * W_out, C_out), lambda n, h: (n, h, 0)),
        ),
        compiler_params=pltpu.CompilerParams(
            # Row tiles are fully independent -> both axes parallel (v7x 2 TCs).
            dimension_semantics=("parallel", "parallel"),
            vmem_limit_bytes=vmem_limit),
    )


def sep_conv2d_nhwc(x_nhwc, w_dw, b_dw, w_pw, b_pw, *, stride=1, padding=0,
                    dilation=1, max_rows_per_tile=None):
    """SepConv2d forward on NHWC input, returns NHWC (no layout HBM passes)."""
    if stride != 1:
        # TODO(synk): stride > 1 needs strided row/column subsampling in-kernel.
        raise NotImplementedError("sep_conv2d Pallas kernel supports stride=1 only")
    N, H, W, C_in = x_nhwc.shape
    K = w_dw.shape[-1]
    C_out = w_pw.shape[0]
    halo = dilation * (K - 1)
    H_out = H + 2 * padding - halo
    W_out = W + 2 * padding - halo
    assert H_out > 0 and W_out > 0

    # Zero-pad spatial dims. TODO(synk): fuse the pad into the kernel via edge
    # masking to save an HBM pass for memory-bound sizes.
    x_pad = x_nhwc
    if padding:
        x_pad = jnp.pad(x_nhwc,
                        ((0, 0), (padding, padding), (padding, padding), (0, 0)))
    Hp, Wp = x_pad.shape[1], x_pad.shape[2]

    # Depthwise weight (C_in,1,K,K) -> tap-major (K*K, 1, C_in).
    wdw = jnp.transpose(w_dw.reshape(C_in, K, K), (1, 2, 0)).reshape(K * K, 1, C_in)
    bdw = b_dw.reshape(1, C_in)
    # Pointwise weight (C_out, C_in, 1, 1) -> (C_in, C_out).
    wpw = jnp.transpose(w_pw.reshape(C_out, C_in), (1, 0))
    bpw = b_pw.reshape(1, C_out)

    TH = _pick_row_tile(H_out, W_out, max_rows=max_rows_per_tile)
    # Guard against a full-height fallback tile blowing the VMEM budget.
    if 2 * ((TH + halo) * Wp * C_in + TH * W_out * C_out) * 4 > (96 << 20):
        # TODO(synk): masked tail tiles for shapes with no sublane-aligned divisor.
        raise ValueError("SepConv2d row tile too large for VMEM; "
                         "pass a smaller max_rows_per_tile")

    args = (x_pad, wdw, bdw, wpw, bpw)
    build = functools.partial(_build_sepconv_call, N, C_in, C_out, Hp, Wp,
                              H_out, W_out, K, dilation, TH, x_nhwc.dtype)
    try:
        out_flat = build(halo_tiled=True)(*args)
    except Exception:  # noqa: BLE001 - fall back if Element halo blocks can't lower
        out_flat = build(halo_tiled=False)(*args)

    return out_flat.reshape(N, H_out, W_out, C_out)


def sep_conv2d(x, w_dw, b_dw, w_pw, b_pw, *, stride=1, padding=0, dilation=1,
               max_rows_per_tile=None):
    """PyTorch-layout SepConv2d forward: x (N,C,H,W) -> (N,C_out,H_out,W_out)."""
    x_nhwc = jnp.transpose(x, (0, 2, 3, 1))  # channels -> lane axis
    out = sep_conv2d_nhwc(x_nhwc, w_dw, b_dw, w_pw, b_pw, stride=stride,
                          padding=padding, dilation=dilation,
                          max_rows_per_tile=max_rows_per_tile)
    # TODO(synk): callers that can consume NHWC should call sep_conv2d_nhwc and
    # skip these two layout HBM passes.
    return jnp.transpose(out, (0, 3, 1, 2))


def _reference(x, w_dw, b_dw, w_pw, b_pw, stride, padding, dilation):
    """Plain-JAX reference of the PyTorch SepConv2d forward."""
    C_in = x.shape[1]
    y = jax.lax.conv_general_dilated(
        x, w_dw, window_strides=(stride, stride),
        padding=[(padding, padding), (padding, padding)],
        rhs_dilation=(dilation, dilation),
        dimension_numbers=("NCHW", "OIHW", "NCHW"),
        feature_group_count=C_in,
        precision=jax.lax.Precision.HIGHEST)
    y = jnp.maximum(y + b_dw[None, :, None, None], 0.0)   # ReLU act_layer
    z = jax.lax.conv_general_dilated(
        y, w_pw, window_strides=(1, 1), padding="VALID",
        dimension_numbers=("NCHW", "OIHW", "NCHW"),
        precision=jax.lax.Precision.HIGHEST)
    return z + b_pw[None, :, None, None]


if __name__ == "__main__":
    key = jax.random.PRNGKey(0)

    # (N, C_in, C_out, H, W, K, padding, dilation, max_rows_per_tile)
    configs = [
        (2, 32, 64, 16, 16, 3, 1, 1, None),  # typical SepConv2d block
        (1, 16, 32, 24, 16, 3, 1, 1, 4),     # forces several overlapping halo row tiles
        (1, 8, 16, 16, 16, 5, 4, 2, None),   # larger kernel + dilation
    ]
    for idx, (N, C_in, C_out, H, W, K, padding, dilation, max_rows) in enumerate(configs):
        key, kx, kw1, kb1, kw2, kb2 = jax.random.split(key, 6)
        x = jax.random.normal(kx, (N, C_in, H, W), dtype=jnp.float32)
        w_dw = jax.random.normal(kw1, (C_in, 1, K, K), dtype=jnp.float32) * 0.2
        b_dw = jax.random.normal(kb1, (C_in,), dtype=jnp.float32) * 0.1
        w_pw = jax.random.normal(kw2, (C_out, C_in, 1, 1), dtype=jnp.float32) * 0.2
        b_pw = jax.random.normal(kb2, (C_out,), dtype=jnp.float32) * 0.1

        out = jax.block_until_ready(
            sep_conv2d(x, w_dw, b_dw, w_pw, b_pw, stride=1, padding=padding,
                       dilation=dilation, max_rows_per_tile=max_rows))
        ref = _reference(x, w_dw, b_dw, w_pw, b_pw, 1, padding, dilation)
        assert out.shape == ref.shape, (idx, out.shape, ref.shape)
        err = float(jnp.max(jnp.abs(out - ref)))
        # Default MXU precision (bf16 operands, f32 accumulate) is intentional;
        # error stays far below this tolerance at these magnitudes.
        assert jnp.allclose(out, ref, atol=2e-2, rtol=2e-2), (idx, err)
    print("KERNEL_OK")
</pallas_src>

<mosaic_0001>
module attributes {stable_mosaic.version = 11 : i64} {
  func.func @_sepconv_kernel(%arg0: i32, %arg1: i32, %arg2: memref<1x18x18x32xf32, #tpu.memory_space<vmem>>, %arg3: memref<9x1x32xf32, #tpu.memory_space<vmem>>, %arg4: memref<1x32xf32, #tpu.memory_space<vmem>>, %arg5: memref<32x64xf32, #tpu.memory_space<vmem>>, %arg6: memref<1x64xf32, #tpu.memory_space<vmem>>, %arg7: memref<1x256x64xf32, #tpu.memory_space<vmem>>) attributes {dimension_semantics = [#tpu.dimension_semantics<parallel>, #tpu.dimension_semantics<parallel>], iteration_bounds = array<i64: 2, 1>, scalar_prefetch = 0 : i64, scratch_operands = 0 : i64, tpu.core_type = #tpu.core_type<tc>, window_params = [{transform_indices = @transform_0, window_bounds = array<i64: 1, 18, 18, 32>}, {pipeline_mode = #tpu.pipeline_mode<synchronous>, transform_indices = @transform_1, window_bounds = array<i64: 9, 1, 32>}, {pipeline_mode = #tpu.pipeline_mode<synchronous>, transform_indices = @transform_2, window_bounds = array<i64: 1, 32>}, {pipeline_mode = #tpu.pipeline_mode<synchronous>, transform_indices = @transform_3, window_bounds = array<i64: 32, 64>}, {pipeline_mode = #tpu.pipeline_mode<synchronous>, transform_indices = @transform_4, window_bounds = array<i64: 1, 64>}, {transform_indices = @transform_5, window_bounds = array<i64: 1, 256, 64>}]} {
    %c16_i32 = arith.constant 16 : i32
    %0 = arith.muli %arg1, %c16_i32 : i32
    %c0 = arith.constant 0 : index
    %1 = arith.index_cast %0 : i32 to index
    %c0_0 = arith.constant 0 : index
    %c0_1 = arith.constant 0 : index
    %2 = vector.load %arg2[%c0, %1, %c0_0, %c0_1] : memref<1x18x18x32xf32, #tpu.memory_space<vmem>>, vector<1x18x18x32xf32>
    %3 = vector.shape_cast %2 : vector<1x18x18x32xf32> to vector<18x18x32xf32>
    %c0_2 = arith.constant 0 : index
    %c0_3 = arith.constant 0 : index
    %c0_4 = arith.constant 0 : index
    %4 = vector.load %arg3[%c0_2, %c0_3, %c0_4] : memref<9x1x32xf32, #tpu.memory_space<vmem>>, vector<9x1x32xf32>
    %c0_5 = arith.constant 0 : index
    %c0_6 = arith.constant 0 : index
    %5 = vector.load %arg4[%c0_5, %c0_6] : memref<1x32xf32, #tpu.memory_space<vmem>>, vector<1x32xf32>
    %cst = arith.constant 0.000000e+00 : f32
    %6 = vector.broadcast %cst : f32 to vector<16x16x32xf32>
    %7 = vector.extract_strided_slice %3 {offsets = [0, 0, 0], sizes = [18, 16, 32], strides = [1, 1, 1]} : vector<18x18x32xf32> to vector<18x16x32xf32>
    %8 = vector.extract_strided_slice %7 {offsets = [0, 0, 0], sizes = [16, 16, 32], strides = [1, 1, 1]} : vector<18x16x32xf32> to vector<16x16x32xf32>
    %9 = vector.extract_strided_slice %4 {offsets = [0, 0, 0], sizes = [1, 1, 32], strides = [1, 1, 1]} : vector<9x1x32xf32> to vector<1x1x32xf32>
    %10 = vector.shape_cast %9 : vector<1x1x32xf32> to vector<1x32xf32>
    %11 = vector.shape_cast %10 : vector<1x32xf32> to vector<1x1x32xf32>
    %12 = vector.broadcast %11 : vector<1x1x32xf32> to vector<16x16x32xf32>
    %13 = arith.mulf %8, %12 : vector<16x16x32xf32>
    %14 = arith.addf %6, %13 : vector<16x16x32xf32>
    %15 = vector.extract_strided_slice %7 {offsets = [1, 0, 0], sizes = [16, 16, 32], strides = [1, 1, 1]} : vector<18x16x32xf32> to vector<16x16x32xf32>
    %16 = vector.extract_strided_slice %4 {offsets = [3, 0, 0], sizes = [1, 1, 32], strides = [1, 1, 1]} : vector<9x1x32xf32> to vector<1x1x32xf32>
    %17 = vector.shape_cast %16 : vector<1x1x32xf32> to vector<1x32xf32>
    %18 = vector.shape_cast %17 : vector<1x32xf32> to vector<1x1x32xf32>
    %19 = vector.broadcast %18 : vector<1x1x32xf32> to vector<16x16x32xf32>
    %20 = arith.mulf %15, %19 : vector<16x16x32xf32>
    %21 = arith.addf %14, %20 : vector<16x16x32xf32>
    %22 = vector.extract_strided_slice %7 {offsets = [2, 0, 0], sizes = [16, 16, 32], strides = [1, 1, 1]} : vector<18x16x32xf32> to vector<16x16x32xf32>
    %23 = vector.extract_strided_slice %4 {offsets = [6, 0, 0], sizes = [1, 1, 32], strides = [1, 1, 1]} : vector<9x1x32xf32> to vector<1x1x32xf32>
    %24 = vector.shape_cast %23 : vector<1x1x32xf32> to vector<1x32xf32>
    %25 = vector.shape_cast %24 : vector<1x32xf32> to vector<1x1x32xf32>
    %26 = vector.broadcast %25 : vector<1x1x32xf32> to vector<16x16x32xf32>
    %27 = arith.mulf %22, %26 : vector<16x16x32xf32>
    %28 = arith.addf %21, %27 : vector<16x16x32xf32>
    %29 = vector.extract_strided_slice %3 {offsets = [0, 1, 0], sizes = [18, 16, 32], strides = [1, 1, 1]} : vector<18x18x32xf32> to vector<18x16x32xf32>
    %30 = vector.extract_strided_slice %29 {offsets = [0, 0, 0], sizes = [16, 16, 32], strides = [1, 1, 1]} : vector<18x16x32xf32> to vector<16x16x32xf32>
    %31 = vector.extract_strided_slice %4 {offsets = [1, 0, 0], sizes = [1, 1, 32], strides = [1, 1, 1]} : vector<9x1x32xf32> to vector<1x1x32xf32>
    %32 = vector.shape_cast %31 : vector<1x1x32xf32> to vector<1x32xf32>
    %33 = vector.shape_cast %32 : vector<1x32xf32> to vector<1x1x32xf32>
    %34 = vector.broadcast %33 : vector<1x1x32xf32> to vector<16x16x32xf32>
    %35 = arith.mulf %30, %34 : vector<16x16x32xf32>
    %36 = arith.addf %28, %35 : vector<16x16x32xf32>
    %37 = vector.extract_strided_slice %29 {offsets = [1, 0, 0], sizes = [16, 16, 32], strides = [1, 1, 1]} : vector<18x16x32xf32> to vector<16x16x32xf32>
    %38 = vector.extract_strided_slice %4 {offsets = [4, 0, 0], sizes = [1, 1, 32], strides = [1, 1, 1]} : vector<9x1x32xf32> to vector<1x1x32xf32>
    %39 = vector.shape_cast %38 : vector<1x1x32xf32> to vector<1x32xf32>
    %40 = vector.shape_cast %39 : vector<1x32xf32> to vector<1x1x32xf32>
    %41 = vector.broadcast %40 : vector<1x1x32xf32> to vector<16x16x32xf32>
    %42 = arith.mulf %37, %41 : vector<16x16x32xf32>
    %43 = arith.addf %36, %42 : vector<16x16x32xf32>
    %44 = vector.extract_strided_slice %29 {offsets = [2, 0, 0], sizes = [16, 16, 32], strides = [1, 1, 1]} : vector<18x16x32xf32> to vector<16x16x32xf32>
    %45 = vector.extract_strided_slice %4 {offsets = [7, 0, 0], sizes = [1, 1, 32], strides = [1, 1, 1]} : vector<9x1x32xf32> to vector<1x1x32xf32>
    %46 = vector.shape_cast %45 : vector<1x1x32xf32> to vector<1x32xf32>
    %47 = vector.shape_cast %46 : vector<1x32xf32> to vector<1x1x32xf32>
    %48 = vector.broadcast %47 : vector<1x1x32xf32> to vector<16x16x32xf32>
    %49 = arith.mulf %44, %48 : vector<16x16x32xf32>
    %50 = arith.addf %43, %49 : vector<16x16x32xf32>
    %51 = vector.extract_strided_slice %3 {offsets = [0, 2, 0], sizes = [18, 16, 32], strides = [1, 1, 1]} : vector<18x18x32xf32> to vector<18x16x32xf32>
    %52 = vector.extract_strided_slice %51 {offsets = [0, 0, 0], sizes = [16, 16, 32], strides = [1, 1, 1]} : vector<18x16x32xf32> to vector<16x16x32xf32>
    %53 = vector.extract_strided_slice %4 {offsets = [2, 0, 0], sizes = [1, 1, 32], strides = [1, 1, 1]} : vector<9x1x32xf32> to vector<1x1x32xf32>
    %54 = vector.shape_cast %53 : vector<1x1x32xf32> to vector<1x32xf32>
    %55 = vector.shape_cast %54 : vector<1x32xf32> to vector<1x1x32xf32>
    %56 = vector.broadcast %55 : vector<1x1x32xf32> to vector<16x16x32xf32>
    %57 = arith.mulf %52, %56 : vector<16x16x32xf32>
    %58 = arith.addf %50, %57 : vector<16x16x32xf32>
    %59 = vector.extract_strided_slice %51 {offsets = [1, 0, 0], sizes = [16, 16, 32], strides = [1, 1, 1]} : vector<18x16x32xf32> to vector<16x16x32xf32>
    %60 = vector.extract_strided_slice %4 {offsets = [5, 0, 0], sizes = [1, 1, 32], strides = [1, 1, 1]} : vector<9x1x32xf32> to vector<1x1x32xf32>
    %61 = vector.shape_cast %60 : vector<1x1x32xf32> to vector<1x32xf32>
    %62 = vector.shape_cast %61 : vector<1x32xf32> to vector<1x1x32xf32>
    %63 = vector.broadcast %62 : vector<1x1x32xf32> to vector<16x16x32xf32>
    %64 = arith.mulf %59, %63 : vector<16x16x32xf32>
    %65 = arith.addf %58, %64 : vector<16x16x32xf32>
    %66 = vector.extract_strided_slice %51 {offsets = [2, 0, 0], sizes = [16, 16, 32], strides = [1, 1, 1]} : vector<18x16x32xf32> to vector<16x16x32xf32>
    %67 = vector.extract_strided_slice %4 {offsets = [8, 0, 0], sizes = [1, 1, 32], strides = [1, 1, 1]} : vector<9x1x32xf32> to vector<1x1x32xf32>
    %68 = vector.shape_cast %67 : vector<1x1x32xf32> to vector<1x32xf32>
    %69 = vector.shape_cast %68 : vector<1x32xf32> to vector<1x1x32xf32>
    %70 = vector.broadcast %69 : vector<1x1x32xf32> to vector<16x16x32xf32>
    %71 = arith.mulf %66, %70 : vector<16x16x32xf32>
    %72 = arith.addf %65, %71 : vector<16x16x32xf32>
    %73 = vector.shape_cast %5 : vector<1x32xf32> to vector<1x1x32xf32>
    %74 = vector.broadcast %73 : vector<1x1x32xf32> to vector<16x16x32xf32>
    %75 = arith.addf %72, %74 : vector<16x16x32xf32>
    %cst_7 = arith.constant 0.000000e+00 : f32
    %76 = vector.broadcast %cst_7 : f32 to vector<16x16x32xf32>
    %77 = arith.maximumf %75, %76 : vector<16x16x32xf32>
    %78 = vector.shape_cast %77 : vector<16x16x32xf32> to vector<256x32xf32>
    %c0_8 = arith.constant 0 : index
    %c0_9 = arith.constant 0 : index
    %79 = vector.load %arg5[%c0_8, %c0_9] : memref<32x64xf32, #tpu.memory_space<vmem>>, vector<32x64xf32>
    %cst_10 = arith.constant dense<0.000000e+00> : vector<256x64xf32>
    %80 = tpu.matmul %78, %79, %cst_10 {dimension_numbers = #tpu.dot_dimension_numbers<[1], [0], [0], [1], [0, 0, 1, 1], [], []>} : vector<256x32xf32>, vector<32x64xf32>, vector<256x64xf32> -> vector<256x64xf32>
    %c0_11 = arith.constant 0 : index
    %c0_12 = arith.constant 0 : index
    %81 = vector.load %arg6[%c0_11, %c0_12] : memref<1x64xf32, #tpu.memory_space<vmem>>, vector<1x64xf32>
    %82 = vector.broadcast %81 : vector<1x64xf32> to vector<256x64xf32>
    %83 = arith.addf %80, %82 : vector<256x64xf32>
    %c0_13 = arith.constant 0 : index
    %c0_14 = arith.constant 0 : index
    %c0_15 = arith.constant 0 : index
    %84 = vector.load %arg7[%c0_13, %c0_14, %c0_15] : memref<1x256x64xf32, #tpu.memory_space<vmem>>, vector<1x256x64xf32>
    %85 = vector.shape_cast %84 : vector<1x256x64xf32> to vector<256x64xf32>
    %86 = vector.shape_cast %83 : vector<256x64xf32> to vector<1x256x64xf32>
    tpu.vector_store %arg7[%c0_13, %c0_14, %c0_15], %86 {strides = array<i32>} : memref<1x256x64xf32, #tpu.memory_space<vmem>>, vector<1x256x64xf32>,
    return
  }
  func.func @transform_0(%arg0: i32, %arg1: i32) -> (i32, i32, i32, i32) {
    %c0_i32 = arith.constant 0 : i32
    %c0_i32_0 = arith.constant 0 : i32
    %c0_i32_1 = arith.constant 0 : i32
    %c0_i32_2 = arith.constant 0 : i32
    return %arg0, %c0_i32, %c0_i32_0, %c0_i32_1 : i32, i32, i32, i32
  }
  func.func @transform_1(%arg0: i32, %arg1: i32) -> (i32, i32, i32) {
    %c0_i32 = arith.constant 0 : i32
    %c0_i32_0 = arith.constant 0 : i32
    %c0_i32_1 = arith.constant 0 : i32
    %c0_i32_2 = arith.constant 0 : i32
    return %c0_i32, %c0_i32_0, %c0_i32_1 : i32, i32, i32
  }
  func.func @transform_2(%arg0: i32, %arg1: i32) -> (i32, i32) {
    %c0_i32 = arith.constant 0 : i32
    %c0_i32_0 = arith.constant 0 : i32
    %c0_i32_1 = arith.constant 0 : i32
    return %c0_i32, %c0_i32_0 : i32, i32
  }
  func.func @transform_3(%arg0: i32, %arg1: i32) -> (i32, i32) {
    %c0_i32 = arith.constant 0 : i32
    %c0_i32_0 = arith.constant 0 : i32
    %c0_i32_1 = arith.constant 0 : i32
    return %c0_i32, %c0_i32_0 : i32, i32
  }
  func.func @transform_4(%arg0: i32, %arg1: i32) -> (i32, i32) {
    %c0_i32 = arith.constant 0 : i32
    %c0_i32_0 = arith.constant 0 : i32
    %c0_i32_1 = arith.constant 0 : i32
    return %c0_i32, %c0_i32_0 : i32, i32
  }
  func.func @transform_5(%arg0: i32, %arg1: i32) -> (i32, i32, i32) {
    %c0_i32 = arith.constant 0 : i32
    %c0_i32_0 = arith.constant 0 : i32
    return %arg0, %arg1, %c0_i32 : i32, i32, i32
  }
}

</mosaic_0001>

<bundles_post_ra>
// kernel: tpu_custom_call.1
= control target key start
LH: loop header
LB: loop body
LE: loop exit
PB: predicated region body
PF: predicated region fallthrough
CT: control target
= control target key end

     0   :  { %s2781_s18 = smov 0   ;;  %s2783_s19 = smov 0   ;;  %s4918_s0 = inlined_call_operand.vmem [shape: f32[2,18,18,32], index: 0, kind: input, shape index: {}]   ;;  %s4919_s1 = inlined_call_operand.vmem [shape: f32[9,1,32], index: 1, kind: input, shape index: {}]   ;;  %s4920_s2 = inlined_call_operand.vmem [shape: f32[1,32], index: 2, kind: input, shape index: {}]   ;;  %s4921_s3 = inlined_call_operand.vmem [shape: f32[32,64], index: 3, kind: input, shape index: {}]   ;;  %s4922_s4 = inlined_call_operand.vmem [shape: f32[1,64], index: 4, kind: input, shape index: {}]   ;;  %s4923_s5 = inlined_call_operand.vmem [shape: f32[2,256,64], index: 5, kind: output, shape index: {}]  }
   0x1   :  { %s2785_s20 = smov 0  }
   0x2 LB: > { %s27_s21 = sadd.s32 1, %s2745_s19  ;;  %p2526_p0 = scmp.ge.s32.totalorder %s2749_s20, 1  ;;  %s2749_s20 = sphi %s2785_s20, %s15_s20   ;;  %s2745_s19 = sphi %s2783_s19, %s4997_s19   ;;  %s2741_s18 = sphi %s2781_s18, %s4996_s18  }
   0x3   : > { %p29_p1 = scmp.ge.s32.totalorder %s27_s21, 2  ;;  %p201_p2 = scmp.lt.s32.totalorder %s2749_s20, 3 }
   0x5   : > { %s4999_s21 = smov (%p29_p1, %s27_s21), 0  ;;  %p202_p3 = pnand %p2526_p0, %p201_p2 }
   0x6   : > { %p233_p4 = scmp.lt.s32.totalorder (!%p202_p3), %s2741_s18, 1 }
   0x7   : > { %205 = sbr.rel (%p202_p3) target bundleno = 532 (0x214), region = 40 }
   0xc   : > { %v2076_v0 = vld [vmem:[%s4921_s3 + $0x18] sm:$0xff]  ;;  %v2075_v1 = vld [vmem:[%s4921_s3 + $0x10] sm:$0xff]  ;;  %v2074_v2 = vld [vmem:[%s4921_s3 + $0x8] sm:$0xff]  ;;  %s5001_s18 = smov (!%p233_p4, %s2741_s18), 1  ;;  %vm627_vm0 = vcmask 1046528   ;;  %vm1366_vm1 = vcmask 1045504  }
   0xd   : > { %2612 = vmatprep.subr.mxu0 %v2076_v0  ;;  %2668 = vmatprep.subr.mxu1 %v2076_v0  ;;  %v2073_v3 = vld [vmem:[%s4921_s3] sm:$0xff]  ;;  %s2676_s30 = smul.u32 432, %s5001_s18  ;;  %v2903_v33 = vld [vmem:[%s4919_s1 + $0x8] ss:$0 sm:$0xff]  ;;  %vm2084_vm2 = vcmask 261120   ;;  %vm2406_vm3 = vcmask 523264  }
   0xe   : > { %2613 = vmatpush3.msra.mxu0 %v2076_v0  ;;  %2672 = vmatpush3.msra.mxu1 %v2076_v0  ;;  %v2817_v4 = vld [vmem:[%s4919_s1] ss:$0 sm:$0xff]  ;;  %v2822_v5 = vld [vmem:[%s4919_s1 + $0x1] ss:$0 sm:$0xff]  ;;  %v2827_v6 = vld [vmem:[%s4919_s1 + $0x3] ss:$0 sm:$0xff] }
   0xf   : > { %2614 = vmatprep.subr.mxu0 %v2075_v1  ;;  %2669 = vmatprep.subr.mxu1 %v2075_v1  ;;  %s2832_s14 = scalar_lea.vmem %s4918_s0, %s2676_s30  ;;  %v2837_v7 = vld [vmem:[%s4919_s1 + $0x4] ss:$0 sm:$0xff]  ;;  %v2842_v8 = vld [vmem:[%s4919_s1 + $0x6] ss:$0 sm:$0xff]  ;;  %v2847_v9 = vld [vmem:[%s4919_s1 + $0x7] ss:$0 sm:$0xff] }
  0x10   : > { %2615 = vmatpush3.msra.mxu0 %v2075_v1  ;;  %2673 = vmatpush3.msra.mxu1 %v2075_v1  ;;  %v251_v10 = vld [vmem:[%s2832_s14] sm:$0xff]  ;;  %v252_v11 = vld [vmem:[%s2832_s14 + $0x8] sm:$0xff]  ;;  %v2852_v12 = vld [vmem:[%s2832_s14 + $0x18] sm:$0xff] }
  0x11   : > { %2616 = vmatprep.subr.mxu0 %v2074_v2  ;;  %2670 = vmatprep.subr.mxu1 %v2074_v2  ;;  %v2855_v13 = vld [vmem:[%s2832_s14 + $0x20] sm:$0xff]  ;;  %v2858_v14 = vld [vmem:[%s2832_s14 + $0x30] sm:$0xff]  ;;  %v321_v15 = vmul.f32 %v2817_v4, %v251_v10  ;;  %v322_v16 = vmul.f32 %v2817_v4, %v252_v11  ;;  %v391_v17 = vmul.f32 %v2827_v6, %v2852_v12  ;;  %v2873_v22 = vld [vmem:[%s2832_s14 + $0x38] sm:$0xff] }
  0x12   : > { %2617 = vmatpush3.msra.mxu0 %v2074_v2  ;;  %2674 = vmatpush3.msra.mxu1 %v2074_v2  ;;  %v392_v18 = vmul.f32 %v2827_v6, %v2855_v13  ;;  %v461_v19 = vmul.f32 %v2842_v8, %v2858_v14  ;;  %v531_v20 = vmul.f32 %v2822_v5, %v251_v10  ;;  %v2878_v23 = vld [vmem:[%s4919_s1 + $0x2] ss:$0 sm:$0xff]  ;;  %v2891_v28 = vld [vmem:[%s4919_s1 + $0x5] ss:$0 sm:$0xff]  ;;  %v2925_v47 = vld [vmem:[%s2832_s14 + $0xd8] sm:$0xff] }
  0x13   : > { %2618 = vmatprep.subr.mxu0 %v2073_v3  ;;  %2671 = vmatprep.subr.mxu1 %v2073_v3  ;;  %v2870_v21 = vmul.f32 %v2822_v5, %v252_v11  ;;  %v423_v24 = vadd.f32 %v391_v17, %v321_v15  ;;  %v778_v25 = vmul.f32 %v2837_v7, %v2852_v12  ;;  %v275_v46 = vld [vmem:[%s2832_s14 + $0xc0] sm:$0xff]  ;;  %v2934_v52 = vld [vmem:[%s2832_s14 + $0xf0] sm:$0xff]  ;;  %v2942_v57 = vld [vmem:[%s2832_s14 + $0xc8] sm:$0xff] }
  0x14   : > { %2619 = vmatpush3.msra.mxu0 %v2073_v3  ;;  %2675 = vmatpush3.msra.mxu1 %v2073_v3  ;;  %v2884_v26 = vmul.f32 %v2837_v7, %v2855_v13  ;;  %v1024_v27 = vmul.f32 %v2847_v9, %v2858_v14  ;;  %v2893_v29 = vadd.f32 %v392_v18, %v322_v16  ;;  %v628_v30 = vrot.slane %v531_v20, 1  ;;  %v2957_v2 = vld [vmem:[%s2832_s14 + $0xe0] sm:$0xff]  ;;  %v2976_v20 = vld [vmem:[%s2832_s14 + $0xf8] sm:$0xff] }
  0x15   : > { %v629_v31 = vrot.slane %v2870_v21, 1  ;;  %v2898_v32 = vmul.f32 %v2847_v9, %v2873_v22  ;;  %v493_v34 = vadd.f32 %v461_v19, %v423_v24  ;;  %v874_v35 = vrot.slane %v778_v25, 1 }
  0x16   : > { %v875_v36 = vrot.slane %v2884_v26, 1  ;;  %v1120_v37 = vrot.slane %v1024_v27, 1  ;;  %v1270_v40 = vmul.f32 %v2878_v23, %v251_v10  ;;  %v2912_v41 = vmul.f32 %v2878_v23, %v252_v11 }
  0x17   : > { %v630_v38 = vsel %vm627_vm0, %v628_v30, %v629_v31  ;;  %v1121_v39 = vrot.slane %v2898_v32, 1  ;;  %v1517_v44 = vmul.f32 %v2891_v28, %v2852_v12  ;;  %v2921_v45 = vmul.f32 %v2891_v28, %v2855_v13 }
  0x18   : > { %v740_v42 = vadd.f32 %v630_v38, %v493_v34  ;;  %v876_v43 = vsel %vm627_vm0, %v874_v35, %v875_v36  ;;  %v1367_v49 = vrot.slane %v1270_v40, 2  ;;  %v1368_v50 = vrot.slane %v2912_v41, 2  ;;  %v2987_v40 = vld [vmem:[%s4920_s2] ss:$0 sm:$0xff] }
  0x19   : > { %v1122_v48 = vsel %vm627_vm0, %v1120_v37, %v1121_v39  ;;  %v1763_v51 = vmul.f32 %v2903_v33, %v2858_v14  ;;  %v1613_v54 = vrot.slane %v1517_v44, 2  ;;  %v1614_v55 = vrot.slane %v2921_v45, 2 }
  0x1a   : > { %v986_v53 = vadd.f32 %v876_v43, %v740_v42  ;;  %v2939_v56 = vmul.f32 %v2903_v33, %v2873_v22  ;;  %v1369_v58 = vsel %vm1366_vm1, %v1367_v49, %v1368_v50  ;;  %v337_v60 = vmul.f32 %v2817_v4, %v275_v46 }
  0x1b   : > { %v1859_v59 = vrot.slane %v1763_v51, 2  ;;  %v407_v61 = vmul.f32 %v2827_v6, %v2925_v47  ;;  %v1615_v63 = vsel %vm1366_vm1, %v1613_v54, %v1614_v55  ;;  %v477_v1 = vmul.f32 %v2842_v8, %v2934_v52 }
  0x1c   : > { %v1232_v62 = vadd.f32 %v1122_v48, %v986_v53  ;;  %v1860_v0 = vrot.slane %v2939_v56, 2  ;;  %v555_v10 = vmul.f32 %v2822_v5, %v275_v46  ;;  %v2962_v11 = vmul.f32 %v2822_v5, %v2942_v57 }
  0x1d   : > { %v439_v3 = vadd.f32 %v407_v61, %v337_v60  ;;  %v802_v15 = vmul.f32 %v2837_v7, %v2925_v47  ;;  %v2971_v18 = vmul.f32 %v2837_v7, %v2957_v2  ;;  %v1048_v19 = vmul.f32 %v2847_v9, %v2934_v52  ;;  %v253_v61 = vld [vmem:[%s2832_s14 + $0x10] sm:$0x3] }
  0x1e   : > { %v1479_v16 = vadd.f32 %v1369_v58, %v1232_v62  ;;  %v1861_v17 = vsel %vm1366_vm1, %v1859_v59, %v1860_v0  ;;  %v668_v25 = vrot.slane %v555_v10, 1  ;;  %v669_v27 = vrot.slane %v2962_v11, 1  ;;  %v3016_v10 = vld [vmem:[%s2832_s14 + $0x28] sm:$0x3] }
  0x1f   : > { %v509_v24 = vadd.f32 %v477_v1, %v439_v3  ;;  %v914_v30 = vrot.slane %v802_v15, 1  ;;  %v915_v35 = vrot.slane %v2971_v18, 1  ;;  %v2982_v37 = vmul.f32 %v2847_v9, %v2976_v20 }
  0x20   : > { %v1725_v34 = vadd.f32 %v1615_v63, %v1479_v16  ;;  %v1160_v38 = vrot.slane %v1048_v19, 1  ;;  %v670_v42 = vsel %vm627_vm0, %v668_v25, %v669_v27  ;;  %v1294_v43 = vmul.f32 %v2878_v23, %v275_v46  ;;  %v3027_v19 = vld [vmem:[%s2832_s14 + $0x40] sm:$0x3] }
  0x21   : > { %v2995_v44 = vmul.f32 %v2878_v23, %v2942_v57  ;;  %v1541_v48 = vmul.f32 %v2891_v28, %v2925_v47  ;;  %v756_v51 = vadd.f32 %v670_v42, %v509_v24  ;;  %v916_v53 = vsel %vm627_vm0, %v914_v30, %v915_v35 }
  0x22   : > { %v1971_v49 = vadd.f32 %v1861_v17, %v1725_v34  ;;  %v1161_v54 = vrot.slane %v2982_v37, 1  ;;  %v1407_v58 = vrot.slane %v1294_v43, 2  ;;  %v3006_v59 = vmul.f32 %v2891_v28, %v2957_v2 }
  0x23   : > { %v1408_v46 = vrot.slane %v2995_v44, 2  ;;  %v1653_v60 = vrot.slane %v1541_v48, 2  ;;  %v1002_v63 = vadd.f32 %v916_v53, %v756_v51  ;;  %v1787_v3 = vmul.f32 %v2903_v33, %v2934_v52 }
  0x24   : > { %v2009_v62 = vadd.f32 %v2987_v40, %v1971_v49  ;;  %v1162_v1 = vsel %vm627_vm0, %v1160_v38, %v1161_v54  ;;  %v4925_v16 = vrot.slane %v3006_v59, 2  ;;  %v3024_v17 = vmul.f32 %v2903_v33, %v2976_v20 }
  0x25   : > { %v1409_v15 = vsel %vm1366_vm1, %v1407_v58, %v1408_v46  ;;  %v462_v24 = vmul.f32 %v2842_v8, %v2873_v22  ;;  %v1248_v30 = vadd.f32 %v1162_v1, %v1002_v63  ;;  %v1899_v34 = vrot.slane %v1787_v3, 2 }
  0x26   : > { %v2041_v25 = vmax.f32 %v2009_v62, 0.0  ;;  %v533_v38 = vmul.f32 %v2822_v5, %v253_v61  ;;  %v1655_v42 = vsel %vm1366_vm1, %v1653_v60, %v4925_v16  ;;  %v4924_v43 = vrot.slane %v3024_v17, 2 }
  0x27   : > { %v494_v48 = vadd.f32 %v462_v24, %v2893_v29  ;;  %v780_v49 = vmul.f32 %v2837_v7, %v3016_v10  ;;  %v1495_v51 = vadd.f32 %v1409_v15, %v1248_v30  ;;  %v1026_v58 = vmul.f32 %v2847_v9, %v3027_v19 }
  0x28   : > { %2620 = vmatprep.mubr.msk.f32.mxu0 %vm2084_vm2, %v2041_v25  ;;  %v631_v53 = vrot.slane %v533_v38, 1  ;;  %v1272_v62 = vmul.f32 %v2878_v23, %v253_v61  ;;  %v1901_v60 = vsel %vm1366_vm1, %v1899_v34, %v4924_v43  ;;  %v1519_v29 = vmul.f32 %v2891_v28, %v3016_v10  ;;  %v3058_v43 = vld [vmem:[%s2832_s14 + $0xe8] sm:$0x3] }
  0x29   : > { %v877_v63 = vrot.slane %v780_v49, 1  ;;  %v1765_v1 = vmul.f32 %v2903_v33, %v3027_v19  ;;  %v1741_v3 = vadd.f32 %v1655_v42, %v1495_v51  ;;  %v1123_v24 = vrot.slane %v1026_v58, 1  ;;  %v277_v49 = vld [vmem:[%s2832_s14 + $0xd0] sm:$0x3] }
  0x2a   : > { %v632_v15 = vsel %vm627_vm0, %v629_v31, %v631_v53  ;;  %v1370_v25 = vrot.slane %v1272_v62, 2  ;;  %v1616_v34 = vrot.slane %v1519_v29, 2  ;;  %v3067_v31 = vld [vmem:[%s2832_s14 + $0x100] sm:$0x3]  ;;  %v338_v26 = vmul.f32 %v2817_v4, %v2942_v57 }
  0x2b   : > { %v741_v61 = vadd.f32 %v632_v15, %v494_v48  ;;  %v878_v30 = vsel %vm627_vm0, %v875_v36, %v877_v63  ;;  %v1862_v38 = vrot.slane %v1765_v1, 2  ;;  %v1987_v16 = vadd.f32 %v1901_v60, %v1741_v3 }
  0x2c   : > { %v1124_v42 = vsel %vm627_vm0, %v1121_v39, %v1123_v24  ;;  %v1371_v21 = vsel %vm1366_vm1, %v1368_v50, %v1370_v25  ;;  %v1617_v48 = vsel %vm1366_vm1, %v1614_v55, %v1616_v34  ;;  %v408_v39 = vmul.f32 %v2827_v6, %v2957_v2 }
  0x2d   : > { %v987_v36 = vadd.f32 %v878_v30, %v741_v61  ;;  %v1863_v32 = vsel %vm1366_vm1, %v1860_v0, %v1862_v38  ;;  %v2025_v41 = vadd.f32 %v2987_v40, %v1987_v16  ;;  %v478_v50 = vmul.f32 %v2842_v8, %v2976_v20  ;;  %v3100_v61 = vld [vmem:[%s2832_s14 + $0x48] sm:$0xff] }
  0x2e   : > { %v557_v51 = vmul.f32 %v2822_v5, %v277_v49  ;;  %v804_v57 = vmul.f32 %v2837_v7, %v3058_v43  ;;  %v440_v53 = vadd.f32 %v408_v39, %v338_v26  ;;  %v1050_v55 = vmul.f32 %v2847_v9, %v3067_v31 }
  0x2f   : > { %v1233_v45 = vadd.f32 %v1124_v42, %v987_v36  ;;  %v1296_v56 = vmul.f32 %v2878_v23, %v277_v49  ;;  %v2057_v0 = vmax.f32 %v2025_v41, 0.0  ;;  %v1543_v16 = vmul.f32 %v2891_v28, %v3058_v43 }
  0x30   : > { %v671_v58 = vrot.slane %v557_v51, 1  ;;  %v917_v62 = vrot.slane %v804_v57, 1  ;;  %v510_v63 = vadd.f32 %v478_v50, %v440_v53  ;;  %v1163_v29 = vrot.slane %v1050_v55, 1  ;;  %v3134_v51 = vld [vmem:[%s2832_s14 + $0x50] sm:$0xff] }
  0x31   : > { %v1480_v60 = vadd.f32 %v1371_v21, %v1233_v45  ;;  %v1410_v1 = vrot.slane %v1296_v56, 2  ;;  %2644 = vmatprep.mubr.msk.f32.mxu1 %vm2084_vm2, %v2057_v0  ;;  %v1656_v24 = vrot.slane %v1543_v16, 2  ;;  %v1789_v25 = vmul.f32 %v2903_v33, %v3067_v31 }
  0x32   : > { %v672_v3 = vsel %vm627_vm0, %v669_v27, %v671_v58  ;;  %v918_v15 = vsel %vm627_vm0, %v915_v35, %v917_v62  ;;  %v1164_v38 = vsel %vm627_vm0, %v1161_v54, %v1163_v29  ;;  %v4960_v18 = vrot.slane %v3006_v59, 2 }
  0x33   : > { %v1726_v30 = vadd.f32 %v1617_v48, %v1480_v60  ;;  %v757_v34 = vadd.f32 %v672_v3, %v510_v63  ;;  %v1411_v11 = vsel %vm1366_vm1, %v1408_v46, %v1410_v1  ;;  %v1902_v35 = vrot.slane %v1789_v25, 2 }
  0x34   : > { %v1657_v27 = vsel %vm1366_vm1, %v4960_v18, %v1656_v24  ;;  %v323_v49 = vmul.f32 %v2817_v4, %v2852_v12  ;;  %v393_v42 = vmul.f32 %v2827_v6, %v2858_v14  ;;  %v463_v54 = vmul.f32 %v2842_v8, %v3100_v61 }
  0x35   : > { %v1972_v21 = vadd.f32 %v1863_v32, %v1726_v30  ;;  %v1003_v37 = vadd.f32 %v918_v15, %v757_v34  ;;  %v534_v44 = vmul.f32 %v2822_v5, %v2852_v12  ;;  %v4961_v46 = vrot.slane %v3024_v17, 2 }
  0x36   : > { %v425_v26 = vadd.f32 %v393_v42, %v323_v49  ;;  %v3124_v36 = vmul.f32 %v2822_v5, %v2855_v13  ;;  %v781_v48 = vmul.f32 %v2837_v7, %v2858_v14  ;;  %v3131_v50 = vmul.f32 %v2837_v7, %v2873_v22 }
  0x37   : > { %v1903_v59 = vsel %vm1366_vm1, %v4961_v46, %v1902_v35  ;;  %v2010_v32 = vadd.f32 %v2987_v40, %v1972_v21  ;;  %v1249_v39 = vadd.f32 %v1164_v38, %v1003_v37  ;;  %v633_v41 = vrot.slane %v534_v44, 1 }
  0x38   : > { %v495_v17 = vadd.f32 %v463_v54, %v425_v26  ;;  %v634_v57 = vrot.slane %v3124_v36, 1  ;;  %v879_v45 = vrot.slane %v781_v48, 1  ;;  %v1027_v53 = vmul.f32 %v2847_v9, %v3100_v61 }
  0x39   : > { %v2042_v55 = vmax.f32 %v2010_v32, 0.0  ;;  %v1496_v56 = vadd.f32 %v1411_v11, %v1249_v39  ;;  %v880_v0 = vrot.slane %v3131_v50, 1  ;;  %v3142_v58 = vmul.f32 %v2847_v9, %v3134_v51 }
  0x3a   : > { %v635_v62 = vsel %vm627_vm0, %v633_v41, %v634_v57  ;;  %v1125_v16 = vrot.slane %v1027_v53, 1  ;;  %v1273_v60 = vmul.f32 %v2878_v23, %v2852_v12  ;;  %v3151_v63 = vmul.f32 %v2878_v23, %v2855_v13 }
  0x3b   : > { %2621 = vmatmul.mubr.msk.f32.vlgmr.msra.gmra.mxu0 %vm2084_vm2, %v2042_v55  ;;  %v1742_v29 = vadd.f32 %v1657_v27, %v1496_v56  ;;  %v742_v1 = vadd.f32 %v635_v62, %v495_v17  ;;  %v881_v3 = vsel %vm627_vm0, %v879_v45, %v880_v0  ;;  %v1126_v15 = vrot.slane %v3142_v58, 1  ;;  %v3171_v27 = vld [vmem:[%s2832_s14 + $0x108] sm:$0xff] }
  0x3c   : > { %v1372_v24 = vrot.slane %v1273_v60, 2  ;;  %v1373_v25 = vrot.slane %v3151_v63, 2  ;;  %v1520_v12 = vmul.f32 %v2891_v28, %v2858_v14  ;;  %v3163_v30 = vmul.f32 %v2891_v28, %v2873_v22  ;;  %v3209_v60 = vld [vmem:[%s2832_s14 + $0x110] sm:$0xff] }
  0x3d   : > { %v1988_v34 = vadd.f32 %v1903_v59, %v1742_v29  ;;  %v988_v38 = vadd.f32 %v881_v3, %v742_v1  ;;  %v1127_v11 = vsel %vm627_vm0, %v1125_v16, %v1126_v15  ;;  %v1766_v18 = vmul.f32 %v2903_v33, %v3100_v61 }
  0x3e   : > { %v1374_v35 = vsel %vm1366_vm1, %v1372_v24, %v1373_v25  ;;  %v1618_v49 = vrot.slane %v1520_v12, 2  ;;  %v1619_v42 = vrot.slane %v3163_v30, 2  ;;  %v3179_v21 = vmul.f32 %v2903_v33, %v3134_v51 }
  0x3f   : > { %v2026_v37 = vadd.f32 %v2987_v40, %v1988_v34  ;;  %v1234_v54 = vadd.f32 %v1127_v11, %v988_v38  ;;  %v1864_v44 = vrot.slane %v1766_v18, 2  ;;  %v339_v46 = vmul.f32 %v2817_v4, %v2925_v47 }
  0x40   : > { %v1620_v59 = vsel %vm1366_vm1, %v1618_v49, %v1619_v42  ;;  %v4931_v26 = vrot.slane %v3179_v21, 2  ;;  %v409_v48 = vmul.f32 %v2827_v6, %v2934_v52  ;;  %v479_v32 = vmul.f32 %v2842_v8, %v3171_v27 }
  0x41   : > { %v2058_v39 = vmax.f32 %v2026_v37, 0.0  ;;  %v1481_v41 = vadd.f32 %v1374_v35, %v1234_v54  ;;  %v558_v17 = vmul.f32 %v2822_v5, %v2925_v47  ;;  %v3196_v45 = vmul.f32 %v2822_v5, %v2957_v2 }
  0x42   : > { %v1866_v53 = vsel %vm1366_vm1, %v1864_v44, %v4931_v26  ;;  %v441_v55 = vadd.f32 %v409_v48, %v339_v46  ;;  %v805_v56 = vmul.f32 %v2837_v7, %v2934_v52  ;;  %v3205_v62 = vmul.f32 %v2837_v7, %v2976_v20 }
  0x43   : > { %2645 = vmatmul.mubr.msk.f32.vlgmr.msra.gmra.mxu1 %vm2084_vm2, %v2058_v39  ;;  %v1727_v16 = vadd.f32 %v1620_v59, %v1481_v41  ;;  %v673_v29 = vrot.slane %v558_v17, 1  ;;  %v4930_v1 = vrot.slane %v3196_v45, 1  ;;  %v1051_v3 = vmul.f32 %v2847_v9, %v3171_v27 }
  0x44   : > { %v511_v24 = vadd.f32 %v479_v32, %v441_v55  ;;  %v919_v12 = vrot.slane %v805_v56, 1  ;;  %v4929_v34 = vrot.slane %v3205_v62, 1  ;;  %v3217_v38 = vmul.f32 %v2847_v9, %v3209_v60 }
  0x45   : > { %v1973_v11 = vadd.f32 %v1866_v53, %v1727_v16  ;;  %v675_v18 = vsel %vm627_vm0, %v673_v29, %v4930_v1  ;;  %v1165_v35 = vrot.slane %v1051_v3, 1  ;;  %v1297_v49 = vmul.f32 %v2878_v23, %v2925_v47  ;;  %v3251_v3 = vld [vmem:[%s2832_s14 + $0x58] sm:$0x3] }
  0x46   : > { %v758_v37 = vadd.f32 %v675_v18, %v511_v24  ;;  %v921_v54 = vsel %vm627_vm0, %v919_v12, %v4929_v34  ;;  %v4928_v44 = vrot.slane %v3217_v38, 1  ;;  %v3230_v46 = vmul.f32 %v2878_v23, %v2957_v2 }
  0x47   : > { %v2011_v59 = vadd.f32 %v2987_v40, %v1973_v11  ;;  %v1412_v48 = vrot.slane %v1297_v49, 2  ;;  %v1544_v32 = vmul.f32 %v2891_v28, %v2934_v52  ;;  %v3237_v47 = vmul.f32 %v2891_v28, %v2976_v20 }
  0x48   : > { %v1004_v39 = vadd.f32 %v921_v54, %v758_v37  ;;  %v1167_v41 = vsel %vm627_vm0, %v1165_v35, %v4928_v44  ;;  %v4927_v17 = vrot.slane %v3230_v46, 2  ;;  %v1790_v53 = vmul.f32 %v2903_v33, %v3171_v27 }
  0x49   : > { %v2043_v55 = vmax.f32 %v2011_v59, 0.0  ;;  %v1658_v56 = vrot.slane %v1544_v32, 2  ;;  %v4926_v16 = vrot.slane %v3237_v47, 2  ;;  %v3248_v29 = vmul.f32 %v2903_v33, %v3209_v60 }
  0x4a   : > { %v1250_v24 = vadd.f32 %v1167_v41, %v1004_v39  ;;  %v1414_v12 = vsel %vm1366_vm1, %v1412_v48, %v4927_v17  ;;  %v1904_v11 = vrot.slane %v1790_v53, 2  ;;  %v324_v18 = vmul.f32 %v2817_v4, %v2855_v13 }
  0x4b   : > { %2623 = vmatprep.mubr.msk.f32.mxu0 %vm2084_vm2, %v2043_v55  ;;  %v1660_v35 = vsel %vm1366_vm1, %v1658_v56, %v4926_v16  ;;  %v1905_v49 = vrot.slane %v3248_v29, 2  ;;  %v394_v37 = vmul.f32 %v2827_v6, %v2873_v22  ;;  %v464_v54 = vmul.f32 %v2842_v8, %v3134_v51 }
  0x4c   : > { %v1497_v59 = vadd.f32 %v1414_v12, %v1250_v24  ;;  %v536_v48 = vmul.f32 %v2822_v5, %v3016_v10  ;;  %v783_v13 = vmul.f32 %v2837_v7, %v3027_v19  ;;  %v1029_v32 = vmul.f32 %v2847_v9, %v3251_v3 }
  0x4d   : > { %v1906_v39 = vsel %vm1366_vm1, %v1904_v11, %v1905_v49  ;;  %v426_v41 = vadd.f32 %v394_v37, %v324_v18  ;;  %v1275_v53 = vmul.f32 %v2878_v23, %v3016_v10  ;;  %v1522_v55 = vmul.f32 %v2891_v28, %v3027_v19 }
  0x4e   : > { %v1743_v56 = vadd.f32 %v1660_v35, %v1497_v59  ;;  %v636_v24 = vrot.slane %v536_v48, 1  ;;  %v882_v12 = vrot.slane %v783_v13, 1  ;;  %v1128_v16 = vrot.slane %v1029_v32, 1  ;;  %v3298_v59 = vld [vmem:[%s2832_s14 + $0x118] sm:$0x3] }
  0x4f   : > { %v496_v17 = vadd.f32 %v464_v54, %v426_v41  ;;  %v1375_v44 = vrot.slane %v1275_v53, 2  ;;  %v1621_v34 = vrot.slane %v1522_v55, 2  ;;  %v1768_v1 = vmul.f32 %v2903_v33, %v3251_v3 }
  0x50   : > { %v1989_v26 = vadd.f32 %v1906_v39, %v1743_v56  ;;  %v637_v11 = vsel %vm627_vm0, %v634_v57, %v636_v24  ;;  %v883_v10 = vsel %vm627_vm0, %v880_v0, %v882_v12  ;;  %v1129_v18 = vsel %vm627_vm0, %v1126_v15, %v1128_v16  ;;  %v3330_v12 = vld [vmem:[%s2832_s14 + $0x60] sm:$0xff] }
  0x51   : > { %v743_v35 = vadd.f32 %v637_v11, %v496_v17  ;;  %v1376_v37 = vsel %vm1366_vm1, %v1373_v25, %v1375_v44  ;;  %v1622_v54 = vsel %vm1366_vm1, %v1619_v42, %v1621_v34  ;;  %v1867_v36 = vrot.slane %v1768_v1, 2 }
  0x52   : > { %v2027_v50 = vadd.f32 %v2987_v40, %v1989_v26  ;;  %v340_v57 = vmul.f32 %v2817_v4, %v2957_v2  ;;  %v410_v0 = vmul.f32 %v2827_v6, %v2976_v20  ;;  %v480_v58 = vmul.f32 %v2842_v8, %v3209_v60 }
  0x53   : > { %v989_v63 = vadd.f32 %v883_v10, %v743_v35  ;;  %v4962_v15 = vrot.slane %v3179_v21, 2  ;;  %v560_v30 = vmul.f32 %v2822_v5, %v3058_v43  ;;  %v807_v42 = vmul.f32 %v2837_v7, %v3067_v31 }
  0x54   : > { %v2059_v26 = vmax.f32 %v2027_v50, 0.0  ;;  %v442_v1 = vadd.f32 %v410_v0, %v340_v57  ;;  %v1053_v2 = vmul.f32 %v2847_v9, %v3298_v59  ;;  %v1299_v34 = vmul.f32 %v2878_v23, %v3058_v43 }
  0x55   : > { %v1868_v25 = vsel %vm1366_vm1, %v4962_v15, %v1867_v36  ;;  %v1235_v44 = vadd.f32 %v1129_v18, %v989_v63  ;;  %v676_v17 = vrot.slane %v560_v30, 1  ;;  %v922_v21 = vrot.slane %v807_v42, 1 }
  0x56   : > { %v1546_v16 = vmul.f32 %v2891_v28, %v3067_v31  ;;  %2647 = vmatprep.mubr.msk.f32.mxu1 %vm2084_vm2, %v2059_v26  ;;  %v512_v48 = vadd.f32 %v480_v58, %v442_v1  ;;  %v1168_v13 = vrot.slane %v1053_v2, 1  ;;  %v1415_v32 = vrot.slane %v1299_v34, 2 }
  0x57   : > { %v1792_v39 = vmul.f32 %v2903_v33, %v3298_v59  ;;  %v1482_v41 = vadd.f32 %v1376_v37, %v1235_v44  ;;  %v4963_v53 = vrot.slane %v3196_v45, 1  ;;  %v4964_v43 = vrot.slane %v3205_v62, 1 }
  0x58   : > { %v1661_v24 = vrot.slane %v1546_v16, 2  ;;  %v4965_v10 = vrot.slane %v3217_v38, 1  ;;  %v4966_v35 = vrot.slane %v3230_v46, 2  ;;  %v4967_v50 = vrot.slane %v3237_v47, 2 }
  0x59   : > { %v677_v55 = vsel %vm627_vm0, %v4963_v53, %v676_v17  ;;  %v923_v56 = vsel %vm627_vm0, %v4964_v43, %v922_v21  ;;  %v1907_v36 = vrot.slane %v1792_v39, 2  ;;  %v1728_v45 = vadd.f32 %v1622_v54, %v1482_v41 }
  0x5a   : > { %v759_v11 = vadd.f32 %v677_v55, %v512_v48  ;;  %v1169_v18 = vsel %vm627_vm0, %v4965_v10, %v1168_v13  ;;  %v1416_v37 = vsel %vm1366_vm1, %v4966_v35, %v1415_v32  ;;  %v1662_v62 = vsel %vm1366_vm1, %v4967_v50, %v1661_v24 }
  0x5b   : > { %v325_v57 = vmul.f32 %v2817_v4, %v2858_v14  ;;  %v395_v0 = vmul.f32 %v2827_v6, %v3100_v61  ;;  %v1908_v46 = vsel %vm1366_vm1, %v1905_v49, %v1907_v36  ;;  %v465_v58 = vmul.f32 %v2842_v8, %v3330_v12 }
  0x5c   : > { %v1005_v38 = vadd.f32 %v923_v56, %v759_v11  ;;  %v537_v47 = vmul.f32 %v2822_v5, %v2858_v14  ;;  %v1974_v54 = vadd.f32 %v1868_v25, %v1728_v45  ;;  %v3354_v15 = vmul.f32 %v2822_v5, %v2873_v22  ;;  %v3366_v25 = vld [vmem:[%s2832_s14 + $0x68] sm:$0xff]  ;;  %v3401_v45 = vld [vmem:[%s2832_s14 + $0x120] sm:$0xff] }
  0x5d   : > { %v427_v63 = vadd.f32 %v395_v0, %v325_v57  ;;  %v784_v30 = vmul.f32 %v2837_v7, %v3100_v61  ;;  %v3360_v29 = vmul.f32 %v2837_v7, %v3134_v51  ;;  %v1030_v49 = vmul.f32 %v2847_v9, %v3330_v12 }
  0x5e   : > { %v1251_v42 = vadd.f32 %v1169_v18, %v1005_v38  ;;  %v638_v26 = vrot.slane %v537_v47, 1  ;;  %v2012_v1 = vadd.f32 %v2987_v40, %v1974_v54  ;;  %v639_v34 = vrot.slane %v3354_v15, 1 }
  0x5f   : > { %v497_v2 = vadd.f32 %v465_v58, %v427_v63  ;;  %v884_v44 = vrot.slane %v784_v30, 1  ;;  %v885_v21 = vrot.slane %v3360_v29, 1  ;;  %v3372_v16 = vmul.f32 %v2847_v9, %v3366_v25 }
  0x60   : > { %v1498_v17 = vadd.f32 %v1416_v37, %v1251_v42  ;;  %v1130_v48 = vrot.slane %v1030_v49, 1  ;;  %v2044_v13 = vmax.f32 %v2012_v1, 0.0  ;;  %v640_v32 = vsel %vm627_vm0, %v638_v26, %v639_v34 }
  0x61   : > { %v1276_v39 = vmul.f32 %v2878_v23, %v2858_v14  ;;  %v3381_v41 = vmul.f32 %v2878_v23, %v2873_v22  ;;  %v744_v55 = vadd.f32 %v640_v32, %v497_v2  ;;  %v886_v43 = vsel %vm627_vm0, %v884_v44, %v885_v21 }
  0x62   : > { %v1744_v53 = vadd.f32 %v1662_v62, %v1498_v17  ;;  %v1131_v56 = vrot.slane %v3372_v16, 1  ;;  %2624 = vmatmul.mubr.msk.f32.gmra.mxu0 %vm2084_vm2, %v2044_v13  ;;  %v1523_v14 = vmul.f32 %v2891_v28, %v3100_v61  ;;  %v3393_v10 = vmul.f32 %v2891_v28, %v3134_v51 }
  0x63   : > { %v1377_v24 = vrot.slane %v1276_v39, 2  ;;  %v1378_v11 = vrot.slane %v3381_v41, 2  ;;  %v990_v35 = vadd.f32 %v886_v43, %v744_v55  ;;  %v1769_v36 = vmul.f32 %v2903_v33, %v3330_v12  ;;  %v3439_v39 = vld [vmem:[%s2832_s14 + $0x128] sm:$0xff] }
  0x64   : > { %v1990_v18 = vadd.f32 %v1908_v46, %v1744_v53  ;;  %v1132_v37 = vsel %vm627_vm0, %v1130_v48, %v1131_v56  ;;  %v1623_v62 = vrot.slane %v1523_v14, 2  ;;  %v1624_v57 = vrot.slane %v3393_v10, 2 }
  0x65   : > { %v1379_v50 = vsel %vm1366_vm1, %v1377_v24, %v1378_v11  ;;  %v3409_v0 = vmul.f32 %v2903_v33, %v3366_v25  ;;  %v1236_v46 = vadd.f32 %v1132_v37, %v990_v35  ;;  %v1869_v58 = vrot.slane %v1769_v36, 2 }
  0x66   : > { %v2028_v38 = vadd.f32 %v2987_v40, %v1990_v18  ;;  %v341_v47 = vmul.f32 %v2817_v4, %v2934_v52  ;;  %v1625_v54 = vsel %vm1366_vm1, %v1623_v62, %v1624_v57  ;;  %v411_v30 = vmul.f32 %v2827_v6, %v3171_v27 }
  0x67   : > { %v4937_v63 = vrot.slane %v3409_v0, 2  ;;  %v481_v42 = vmul.f32 %v2842_v8, %v3401_v45  ;;  %v1483_v49 = vadd.f32 %v1379_v50, %v1236_v46  ;;  %v561_v1 = vmul.f32 %v2822_v5, %v2934_v52 }
  0x68   : > { %v2060_v26 = vmax.f32 %v2028_v38, 0.0  ;;  %v3426_v2 = vmul.f32 %v2822_v5, %v2976_v20  ;;  %v443_v17 = vadd.f32 %v411_v30, %v341_v47  ;;  %v808_v48 = vmul.f32 %v2837_v7, %v3171_v27 }
  0x69   : > { %v1871_v44 = vsel %vm1366_vm1, %v1869_v58, %v4937_v63  ;;  %v3435_v13 = vmul.f32 %v2837_v7, %v3209_v60  ;;  %v1729_v32 = vadd.f32 %v1625_v54, %v1483_v49  ;;  %v678_v53 = vrot.slane %v561_v1, 1 }
  0x6a   : > { %2648 = vmatmul.mubr.msk.f32.gmra.mxu1 %vm2084_vm2, %v2060_v26  ;;  %v4936_v55 = vrot.slane %v3426_v2, 1  ;;  %v1054_v43 = vmul.f32 %v2847_v9, %v3401_v45  ;;  %v513_v24 = vadd.f32 %v481_v42, %v443_v17  ;;  %v924_v14 = vrot.slane %v808_v48, 1 }
  0x6b   : > { %v4935_v18 = vrot.slane %v3435_v13, 1  ;;  %v3447_v35 = vmul.f32 %v2847_v9, %v3439_v39  ;;  %v1975_v37 = vadd.f32 %v1871_v44, %v1729_v32  ;;  %v1300_v62 = vmul.f32 %v2878_v23, %v2934_v52 }
  0x6c   : > { %v680_v36 = vsel %vm627_vm0, %v678_v53, %v4936_v55  ;;  %v1170_v50 = vrot.slane %v1054_v43, 1  ;;  %v3460_v47 = vmul.f32 %v2878_v23, %v2976_v20  ;;  %v1547_v42 = vmul.f32 %v2891_v28, %v3171_v27  ;;  %v3481_v43 = vld [vmem:[%s2832_s14 + $0x70] sm:$0x3] }
  0x6d   : > { %v760_v38 = vadd.f32 %v680_v36, %v513_v24  ;;  %v926_v46 = vsel %vm627_vm0, %v924_v14, %v4935_v18  ;;  %v4934_v58 = vrot.slane %v3447_v35, 1  ;;  %v2013_v54 = vadd.f32 %v2987_v40, %v1975_v37 }
  0x6e   : > { %v1417_v30 = vrot.slane %v1300_v62, 2  ;;  %v3467_v52 = vmul.f32 %v2891_v28, %v3209_v60  ;;  %v4933_v1 = vrot.slane %v3460_v47, 2  ;;  %v1793_v44 = vmul.f32 %v2903_v33, %v3401_v45 }
  0x6f   : > { %v1006_v26 = vadd.f32 %v926_v46, %v760_v38  ;;  %v1172_v49 = vsel %vm627_vm0, %v1170_v50, %v4934_v58  ;;  %v2045_v17 = vmax.f32 %v2013_v54, 0.0  ;;  %v1663_v48 = vrot.slane %v1547_v42, 2 }
  0x70   : > { %v4932_v32 = vrot.slane %v3467_v52, 2  ;;  %v3478_v53 = vmul.f32 %v2903_v33, %v3439_v39  ;;  %v1419_v14 = vsel %vm1366_vm1, %v1417_v30, %v4933_v1  ;;  %v1909_v37 = vrot.slane %v1793_v44, 2 }
  0x71   : > { %v1252_v24 = vadd.f32 %v1172_v49, %v1006_v26  ;;  %v326_v36 = vmul.f32 %v2817_v4, %v2873_v22  ;;  %2626 = vmatprep.mubr.msk.f32.mxu0 %vm2084_vm2, %v2045_v17  ;;  %v396_v38 = vmul.f32 %v2827_v6, %v3134_v51  ;;  %v466_v46 = vmul.f32 %v2842_v8, %v3366_v25 }
  0x72   : > { %v1665_v50 = vsel %vm1366_vm1, %v1663_v48, %v4932_v32  ;;  %v1910_v62 = vrot.slane %v3478_v53, 2  ;;  %v539_v30 = vmul.f32 %v2822_v5, %v3027_v19  ;;  %v786_v22 = vmul.f32 %v2837_v7, %v3251_v3 }
  0x73   : > { %v1499_v54 = vadd.f32 %v1419_v14, %v1252_v24  ;;  %v1032_v42 = vmul.f32 %v2847_v9, %v3481_v43  ;;  %v428_v49 = vadd.f32 %v396_v38, %v326_v36  ;;  %v1278_v44 = vmul.f32 %v2878_v23, %v3027_v19 }
  0x74   : > { %v1911_v26 = vsel %vm1366_vm1, %v1909_v37, %v1910_v62  ;;  %v1525_v17 = vmul.f32 %v2891_v28, %v3251_v3  ;;  %v641_v24 = vrot.slane %v539_v30, 1  ;;  %v887_v14 = vrot.slane %v786_v22, 1 }
  0x75   : > { %v1745_v48 = vadd.f32 %v1665_v50, %v1499_v54  ;;  %v1133_v32 = vrot.slane %v1032_v42, 1  ;;  %v498_v1 = vadd.f32 %v466_v46, %v428_v49  ;;  %v1380_v58 = vrot.slane %v1278_v44, 2  ;;  %v3528_v54 = vld [vmem:[%s2832_s14 + $0x130] sm:$0x3] }
  0x76   : > { %v1626_v18 = vrot.slane %v1525_v17, 2  ;;  %v1771_v55 = vmul.f32 %v2903_v33, %v3481_v43  ;;  %v642_v37 = vsel %vm627_vm0, %v639_v34, %v641_v24  ;;  %v888_v19 = vsel %vm627_vm0, %v885_v21, %v887_v14  ;;  %v3560_v14 = vld [vmem:[%s2832_s14 + $0x78] sm:$0xff] }
  0x77   : > { %v1991_v63 = vadd.f32 %v1911_v26, %v1745_v48  ;;  %v1134_v36 = vsel %vm627_vm0, %v1131_v56, %v1133_v32  ;;  %v745_v50 = vadd.f32 %v642_v37, %v498_v1  ;;  %v1381_v38 = vsel %vm1366_vm1, %v1378_v11, %v1380_v58 }
  0x78   : > { %v1627_v46 = vsel %vm1366_vm1, %v1624_v57, %v1626_v18  ;;  %v1872_v15 = vrot.slane %v1771_v55, 2  ;;  %v342_v34 = vmul.f32 %v2817_v4, %v2976_v20  ;;  %v412_v21 = vmul.f32 %v2827_v6, %v3209_v60 }
  0x79   : > { %v2029_v29 = vadd.f32 %v2987_v40, %v1991_v63  ;;  %v482_v16 = vmul.f32 %v2842_v8, %v3439_v39  ;;  %v991_v41 = vadd.f32 %v888_v19, %v745_v50  ;;  %v4968_v56 = vrot.slane %v3409_v0, 2 }
  0x7a   : > { %v563_v10 = vmul.f32 %v2822_v5, %v3067_v31  ;;  %v810_v57 = vmul.f32 %v2837_v7, %v3298_v59  ;;  %v444_v55 = vadd.f32 %v412_v21, %v342_v34  ;;  %v1056_v20 = vmul.f32 %v2847_v9, %v3528_v54 }
  0x7b   : > { %v1873_v11 = vsel %vm1366_vm1, %v4968_v56, %v1872_v15  ;;  %v2061_v63 = vmax.f32 %v2029_v29, 0.0  ;;  %v1302_v18 = vmul.f32 %v2878_v23, %v3067_v31  ;;  %v1237_v58 = vadd.f32 %v1134_v36, %v991_v41 }
  0x7c   : > { %v681_v1 = vrot.slane %v563_v10, 1  ;;  %v927_v0 = vrot.slane %v810_v57, 1  ;;  %v1549_v32 = vmul.f32 %v2891_v28, %v3298_v59  ;;  %v514_v30 = vadd.f32 %v482_v16, %v444_v55 }
  0x7d   : > { %2650 = vmatprep.mubr.msk.f32.mxu1 %vm2084_vm2, %v2061_v63  ;;  %v1173_v22 = vrot.slane %v1056_v20, 1  ;;  %v1420_v42 = vrot.slane %v1302_v18, 2  ;;  %v1795_v26 = vmul.f32 %v2903_v33, %v3528_v54  ;;  %v1484_v49 = vadd.f32 %v1381_v38, %v1237_v58 }
  0x7e   : > { %v4969_v44 = vrot.slane %v3426_v2, 1  ;;  %v4970_v31 = vrot.slane %v3435_v13, 1  ;;  %v1666_v24 = vrot.slane %v1549_v32, 2  ;;  %v4971_v19 = vrot.slane %v3447_v35, 1 }
  0x7f   : > { %v4972_v50 = vrot.slane %v3460_v47, 2  ;;  %v1912_v15 = vrot.slane %v1795_v26, 2  ;;  %v1730_v2 = vadd.f32 %v1627_v46, %v1484_v49  ;;  %v4973_v29 = vrot.slane %v3467_v52, 2 }
  0x80   : > { %v682_v17 = vsel %vm627_vm0, %v4969_v44, %v681_v1  ;;  %v928_v48 = vsel %vm627_vm0, %v4970_v31, %v927_v0  ;;  %v1174_v36 = vsel %vm627_vm0, %v4971_v19, %v1173_v22  ;;  %v327_v34 = vmul.f32 %v2817_v4, %v3100_v61 }
  0x81   : > { %v761_v37 = vadd.f32 %v682_v17, %v514_v30  ;;  %v1421_v38 = vsel %vm1366_vm1, %v4972_v50, %v1420_v42  ;;  %v1667_v13 = vsel %vm1366_vm1, %v4973_v29, %v1666_v24  ;;  %v397_v21 = vmul.f32 %v2827_v6, %v3330_v12  ;;  %v3631_v24 = vld [vmem:[%s2832_s14 + $0x138] sm:$0xff] }
  0x82   : > { %v1913_v47 = vsel %vm1366_vm1, %v1910_v62, %v1912_v15  ;;  %v467_v16 = vmul.f32 %v2842_v8, %v3560_v14  ;;  %v540_v52 = vmul.f32 %v2822_v5, %v3100_v61  ;;  %v1976_v46 = vadd.f32 %v1873_v11, %v1730_v2  ;;  %v3596_v11 = vld [vmem:[%s2832_s14 + $0x80] sm:$0xff] }
  0x83   : > { %v1007_v35 = vadd.f32 %v928_v48, %v761_v37  ;;  %v429_v41 = vadd.f32 %v397_v21, %v327_v34  ;;  %v3584_v56 = vmul.f32 %v2822_v5, %v3134_v51  ;;  %v787_v4 = vmul.f32 %v2837_v7, %v3330_v12  ;;  %v3645_v2 = vld [vmem:[%s4919_s1] ss:$0 sm:$0xff] }
  0x84   : > { %v643_v10 = vrot.slane %v540_v52, 1  ;;  %v3590_v53 = vmul.f32 %v2837_v7, %v3366_v25  ;;  %v1033_v8 = vmul.f32 %v2847_v9, %v3560_v14  ;;  %v2014_v62 = vadd.f32 %v2987_v40, %v1976_v46  ;;  %v3670_v46 = vld [vmem:[%s4919_s1 + $0x1] ss:$0 sm:$0xff] }
  0x85   : > { %v1253_v6 = vadd.f32 %v1174_v36, %v1007_v35  ;;  %v499_v57 = vadd.f32 %v467_v16, %v429_v41  ;;  %v644_v5 = vrot.slane %v3584_v56, 1  ;;  %v889_v63 = vrot.slane %v787_v4, 1  ;;  %v3663_v35 = vld [vmem:[%s4919_s1 + $0x6] ss:$0 sm:$0xff] }
  0x86   : > { %v890_v20 = vrot.slane %v3590_v53, 1  ;;  %v3602_v18 = vmul.f32 %v2847_v9, %v3596_v11  ;;  %v1135_v7 = vrot.slane %v1033_v8, 1  ;;  %v2046_v58 = vmax.f32 %v2014_v62, 0.0  ;;  %v3684_v8 = vld [vmem:[%s4919_s1 + $0x4] ss:$0 sm:$0xff] }
  0x87   : > { %v1500_v55 = vadd.f32 %v1421_v38, %v1253_v6  ;;  %v645_v1 = vsel %vm627_vm0, %v643_v10, %v644_v5  ;;  %v1279_v0 = vmul.f32 %v2878_v23, %v3100_v61  ;;  %v3611_v32 = vmul.f32 %v2878_v23, %v3134_v51  ;;  %v3808_v53 = vld [vmem:[%s4920_s2] ss:$0 sm:$0xff] }
  0x88   : > { %v746_v22 = vadd.f32 %v645_v1, %v499_v57  ;;  %v891_v9 = vsel %vm627_vm0, %v889_v63, %v890_v20  ;;  %v1136_v42 = vrot.slane %v3602_v18, 1  ;;  %2627 = vmatmul.mubr.msk.f32.gmra.mxu0 %vm2084_vm2, %v2046_v58  ;;  %v1526_v61 = vmul.f32 %v2891_v28, %v3330_v12  ;;  %v3700_v1 = vld [vmem:[%s4919_s1 + $0x7] ss:$0 sm:$0xff] }
  0x89   : > { %v1746_v30 = vadd.f32 %v1667_v13, %v1500_v55  ;;  %v1382_v26 = vrot.slane %v1279_v0, 2  ;;  %v1383_v49 = vrot.slane %v3611_v32, 2  ;;  %v3623_v23 = vmul.f32 %v2891_v28, %v3366_v25  ;;  %v3694_v55 = vld [vmem:[%s2832_s14 + $0x140] sm:$0xff] }
  0x8a   : > { %v992_v17 = vadd.f32 %v891_v9, %v746_v22  ;;  %v1137_v31 = vsel %vm627_vm0, %v1135_v7, %v1136_v42  ;;  %v1772_v48 = vmul.f32 %v2903_v33, %v3560_v14  ;;  %v1628_v19 = vrot.slane %v1526_v61, 2 }
  0x8b   : > { %v1992_v44 = vadd.f32 %v1913_v47, %v1746_v30  ;;  %v1384_v37 = vsel %vm1366_vm1, %v1382_v26, %v1383_v49  ;;  %v1629_v36 = vrot.slane %v3623_v23, 2  ;;  %v3639_v28 = vmul.f32 %v2903_v33, %v3596_v11  ;;  %v3656_v33 = vld [vmem:[%s4919_s1 + $0x3] ss:$0 sm:$0xff] }
  0x8c   : > { %v1238_v38 = vadd.f32 %v1137_v31, %v992_v17  ;;  %v1874_v15 = vrot.slane %v1772_v48, 2  ;;  %v343_v29 = vmul.f32 %v3645_v2, %v3171_v27  ;;  %v413_v21 = vmul.f32 %v3656_v33, %v3401_v45  ;;  %v3715_v31 = vld [vmem:[%s4919_s1 + $0x2] ss:$0 sm:$0xff] }
  0x8d   : > { %v2030_v50 = vadd.f32 %v2987_v40, %v1992_v44  ;;  %v1630_v13 = vsel %vm1366_vm1, %v1628_v19, %v1629_v36  ;;  %v1875_v34 = vrot.slane %v3639_v28, 2  ;;  %v483_v47 = vmul.f32 %v3663_v35, %v3631_v24 }
  0x8e   : > { %v1485_v52 = vadd.f32 %v1384_v37, %v1238_v38  ;;  %v564_v41 = vmul.f32 %v3670_v46, %v3171_v27  ;;  %v3676_v4 = vmul.f32 %v3670_v46, %v3209_v60  ;;  %v445_v10 = vadd.f32 %v413_v21, %v343_v29 }
  0x8f   : > { %v2062_v16 = vmax.f32 %v2030_v50, 0.0  ;;  %v1876_v6 = vsel %vm1366_vm1, %v1874_v15, %v1875_v34  ;;  %v811_v62 = vmul.f32 %v3684_v8, %v3401_v45  ;;  %v3690_v57 = vmul.f32 %v3684_v8, %v3439_v39 }
  0x90   : > { %v1731_v63 = vadd.f32 %v1630_v13, %v1485_v52  ;;  %v683_v7 = vrot.slane %v564_v41, 1  ;;  %v4942_v58 = vrot.slane %v3676_v4, 1  ;;  %v1057_v0 = vmul.f32 %v3700_v1, %v3631_v24  ;;  %v3731_v13 = vld [vmem:[%s4919_s1 + $0x5] ss:$0 sm:$0xff]  ;;  %v3746_v52 = vld [vmem:[%s4919_s1 + $0x8] ss:$0 sm:$0xff] }
  0x91   : > { %2651 = vmatmul.mubr.msk.f32.gmra.mxu1 %vm2084_vm2, %v2062_v16  ;;  %v515_v30 = vadd.f32 %v483_v47, %v445_v10  ;;  %v929_v22 = vrot.slane %v811_v62, 1  ;;  %v4941_v9 = vrot.slane %v3690_v57, 1  ;;  %v3707_v26 = vmul.f32 %v3700_v1, %v3694_v55 }
  0x92   : > { %v1977_v61 = vadd.f32 %v1876_v6, %v1731_v63  ;;  %v685_v44 = vsel %vm627_vm0, %v683_v7, %v4942_v58  ;;  %v1175_v17 = vrot.slane %v1057_v0, 1  ;;  %v1303_v48 = vmul.f32 %v3715_v31, %v3171_v27  ;;  %v3756_v7 = vld [vmem:[%s2832_s14 + $0x88] sm:$0x3] }
  0x93   : > { %v762_v37 = vadd.f32 %v685_v44, %v515_v30  ;;  %v931_v19 = vsel %vm627_vm0, %v929_v22, %v4941_v9  ;;  %v4940_v50 = vrot.slane %v3707_v26, 1  ;;  %v3725_v38 = vmul.f32 %v3715_v31, %v3209_v60 }
  0x94   : > { %v2015_v15 = vadd.f32 %v2987_v40, %v1977_v61  ;;  %v1422_v29 = vrot.slane %v1303_v48, 2  ;;  %v1550_v27 = vmul.f32 %v3731_v13, %v3401_v45  ;;  %v3737_v21 = vmul.f32 %v3731_v13, %v3439_v39 }
  0x95   : > { %v1008_v47 = vadd.f32 %v931_v19, %v762_v37  ;;  %v1177_v16 = vsel %vm627_vm0, %v1175_v17, %v4940_v50  ;;  %v4939_v40 = vrot.slane %v3725_v38, 2  ;;  %v1796_v41 = vmul.f32 %v3746_v52, %v3631_v24 }
  0x96   : > { %v2047_v6 = vmax.f32 %v2015_v15, 0.0  ;;  %v1668_v10 = vrot.slane %v1550_v27, 2  ;;  %v4938_v62 = vrot.slane %v3737_v21, 2  ;;  %v3753_v63 = vmul.f32 %v3746_v52, %v3694_v55 }
  0x97   : > { %v1254_v0 = vadd.f32 %v1177_v16, %v1008_v47  ;;  %v1424_v30 = vsel %vm1366_vm1, %v1422_v29, %v4939_v40  ;;  %v1914_v22 = vrot.slane %v1796_v41, 2  ;;  %v328_v61 = vmul.f32 %v3645_v2, %v3134_v51 }
  0x98   : > { %2629 = vmatprep.mubr.msk.f32.mxu0 %vm2084_vm2, %v2047_v6  ;;  %v1670_v44 = vsel %vm1366_vm1, %v1668_v10, %v4938_v62  ;;  %v1915_v17 = vrot.slane %v3753_v63, 2  ;;  %v398_v48 = vmul.f32 %v3656_v33, %v3366_v25  ;;  %v468_v37 = vmul.f32 %v3663_v35, %v3596_v11 }
  0x99   : > { %v1501_v19 = vadd.f32 %v1424_v30, %v1254_v0  ;;  %v542_v15 = vmul.f32 %v3670_v46, %v3251_v3  ;;  %v789_v51 = vmul.f32 %v3684_v8, %v3481_v43  ;;  %v1035_v29 = vmul.f32 %v3700_v1, %v3756_v7 }
  0x9a   : > { %v1916_v27 = vsel %vm1366_vm1, %v1914_v22, %v1915_v17  ;;  %v430_v47 = vadd.f32 %v398_v48, %v328_v61  ;;  %v1281_v16 = vmul.f32 %v3715_v31, %v3251_v3  ;;  %v1528_v41 = vmul.f32 %v3731_v13, %v3481_v43 }
  0x9b   : > { %v1747_v6 = vadd.f32 %v1670_v44, %v1501_v19  ;;  %v646_v10 = vrot.slane %v542_v15, 1  ;;  %v892_v0 = vrot.slane %v789_v51, 1  ;;  %v1138_v30 = vrot.slane %v1035_v29, 1  ;;  %v3803_v19 = vld [vmem:[%s2832_s14 + $0x148] sm:$0x3] }
  0x9c   : > { %v500_v62 = vadd.f32 %v468_v37, %v430_v47  ;;  %v1385_v40 = vrot.slane %v1281_v16, 2  ;;  %v1631_v50 = vrot.slane %v1528_v41, 2  ;;  %v1774_v9 = vmul.f32 %v3746_v52, %v3756_v7 }
  0x9d   : > { %v1993_v58 = vadd.f32 %v1916_v27, %v1747_v6  ;;  %v647_v22 = vsel %vm627_vm0, %v644_v5, %v646_v10  ;;  %v893_v3 = vsel %vm627_vm0, %v890_v20, %v892_v0  ;;  %v1139_v61 = vsel %vm627_vm0, %v1136_v42, %v1138_v30  ;;  %v3840_v0 = vld [vmem:[%s2832_s14 + $0x90] sm:$0xff] }
  0x9e   : > { %v747_v44 = vadd.f32 %v647_v22, %v500_v62  ;;  %v1386_v48 = vsel %vm1366_vm1, %v1383_v49, %v1385_v40  ;;  %v1632_v37 = vsel %vm1366_vm1, %v1629_v36, %v1631_v50  ;;  %v1877_v56 = vrot.slane %v1774_v9, 2 }
  0x9f   : > { %v2031_v5 = vadd.f32 %v3808_v53, %v1993_v58  ;;  %v344_v20 = vmul.f32 %v3645_v2, %v3209_v60  ;;  %v414_v18 = vmul.f32 %v3656_v33, %v3439_v39  ;;  %v484_v32 = vmul.f32 %v3663_v35, %v3694_v55 }
  0xa0   : > { %v993_v42 = vadd.f32 %v893_v3, %v747_v44  ;;  %v1878_v49 = vsel %vm1366_vm1, %v1875_v34, %v1877_v56  ;;  %v566_v23 = vmul.f32 %v3670_v46, %v3298_v59  ;;  %v813_v36 = vmul.f32 %v3684_v8, %v3528_v54 }
  0xa1   : > { %v2063_v58 = vmax.f32 %v2031_v5, 0.0  ;;  %v446_v9 = vadd.f32 %v414_v18, %v344_v20  ;;  %v1059_v60 = vmul.f32 %v3700_v1, %v3803_v19  ;;  %v1305_v50 = vmul.f32 %v3715_v31, %v3298_v59 }
  0xa2   : > { %v1239_v40 = vadd.f32 %v1139_v61, %v993_v42  ;;  %v686_v62 = vrot.slane %v566_v23, 1  ;;  %v932_v28 = vrot.slane %v813_v36, 1  ;;  %v1552_v34 = vmul.f32 %v3731_v13, %v3528_v54 }
  0xa3   : > { %2653 = vmatprep.mubr.msk.f32.mxu1 %vm2084_vm2, %v2063_v58  ;;  %v516_v15 = vadd.f32 %v484_v32, %v446_v9  ;;  %v1178_v51 = vrot.slane %v1059_v60, 1  ;;  %v1425_v29 = vrot.slane %v1305_v50, 2  ;;  %v1798_v27 = vmul.f32 %v3746_v52, %v3803_v19 }
  0xa4   : > { %v1486_v47 = vadd.f32 %v1386_v48, %v1239_v40  ;;  %v4974_v16 = vrot.slane %v3676_v4, 1  ;;  %v4975_v59 = vrot.slane %v3690_v57, 1  ;;  %v1671_v10 = vrot.slane %v1552_v34, 2 }
  0xa5   : > { %v4976_v22 = vrot.slane %v3707_v26, 1  ;;  %v4977_v61 = vrot.slane %v3725_v38, 2  ;;  %v1917_v48 = vrot.slane %v1798_v27, 2  ;;  %v4978_v56 = vrot.slane %v3737_v21, 2 }
  0xa6   : > { %v687_v41 = vsel %vm627_vm0, %v4974_v16, %v686_v62  ;;  %v933_v6 = vsel %vm627_vm0, %v4975_v59, %v932_v28  ;;  %v1732_v4 = vadd.f32 %v1632_v37, %v1486_v47  ;;  %v329_v5 = vmul.f32 %v3645_v2, %v3330_v12 }
  0xa7   : > { %v763_v30 = vadd.f32 %v687_v41, %v516_v15  ;;  %v1179_v3 = vsel %vm627_vm0, %v4976_v22, %v1178_v51  ;;  %v1426_v44 = vsel %vm1366_vm1, %v4977_v61, %v1425_v29  ;;  %v1672_v57 = vsel %vm1366_vm1, %v4978_v56, %v1671_v10 }
  0xa8   : > { %v399_v20 = vmul.f32 %v3656_v33, %v3560_v14  ;;  %v1918_v38 = vsel %vm1366_vm1, %v1915_v17, %v1917_v48  ;;  %v469_v18 = vmul.f32 %v3663_v35, %v3840_v0  ;;  %v543_v21 = vmul.f32 %v3670_v46, %v3330_v12 }
  0xa9   : > { %v1009_v26 = vadd.f32 %v933_v6, %v763_v30  ;;  %v1978_v37 = vadd.f32 %v1878_v49, %v1732_v4  ;;  %v3864_v42 = vmul.f32 %v3670_v46, %v3366_v25  ;;  %v790_v23 = vmul.f32 %v3684_v8, %v3560_v14  ;;  %v3876_v49 = vld [vmem:[%s2832_s14 + $0x98] sm:$0xff]  ;;  %v3911_v4 = vld [vmem:[%s2832_s14 + $0x150] sm:$0xff] }
  0xaa   : > { %v431_v32 = vadd.f32 %v399_v20, %v329_v5  ;;  %v648_v58 = vrot.slane %v543_v21, 1  ;;  %v3870_v63 = vmul.f32 %v3684_v8, %v3596_v11  ;;  %v1036_v17 = vmul.f32 %v3700_v1, %v3840_v0 }
  0xab   : > { %v1255_v36 = vadd.f32 %v1179_v3, %v1009_v26  ;;  %v2016_v9 = vadd.f32 %v3808_v53, %v1978_v37  ;;  %v649_v50 = vrot.slane %v3864_v42, 1  ;;  %v894_v40 = vrot.slane %v790_v23, 1 }
  0xac   : > { %v501_v60 = vadd.f32 %v469_v18, %v431_v32  ;;  %v895_v28 = vrot.slane %v3870_v63, 1  ;;  %v3882_v34 = vmul.f32 %v3700_v1, %v3876_v49  ;;  %v1140_v15 = vrot.slane %v1036_v17, 1 }
  0xad   : > { %v1502_v62 = vadd.f32 %v1426_v44, %v1255_v36  ;;  %v2048_v51 = vmax.f32 %v2016_v9, 0.0  ;;  %v650_v29 = vsel %vm627_vm0, %v648_v58, %v649_v50  ;;  %v1282_v27 = vmul.f32 %v3715_v31, %v3330_v12 }
  0xae   : > { %v3891_v47 = vmul.f32 %v3715_v31, %v3366_v25  ;;  %v748_v41 = vadd.f32 %v650_v29, %v501_v60  ;;  %v896_v59 = vsel %vm627_vm0, %v894_v40, %v895_v28  ;;  %v1141_v6 = vrot.slane %v3882_v34, 1 }
  0xaf   : > { %v1748_v16 = vadd.f32 %v1672_v57, %v1502_v62  ;;  %2630 = vmatmul.mubr.msk.f32.gmra.mxu0 %vm2084_vm2, %v2048_v51  ;;  %v1387_v10 = vrot.slane %v1282_v27, 2  ;;  %v1529_v12 = vmul.f32 %v3731_v13, %v3560_v14  ;;  %v3903_v22 = vmul.f32 %v3731_v13, %v3596_v11  ;;  %v3949_v27 = vld [vmem:[%s2832_s14 + $0x158] sm:$0xff] }
  0xb0   : > { %v1388_v30 = vrot.slane %v3891_v47, 2  ;;  %v994_v61 = vadd.f32 %v896_v59, %v748_v41  ;;  %v1142_v44 = vsel %vm627_vm0, %v1140_v15, %v1141_v6  ;;  %v1775_v48 = vmul.f32 %v3746_v52, %v3840_v0 }
  0xb1   : > { %v1994_v3 = vadd.f32 %v1918_v38, %v1748_v16  ;;  %v1633_v57 = vrot.slane %v1529_v12, 2  ;;  %v1634_v5 = vrot.slane %v3903_v22, 2  ;;  %v3919_v20 = vmul.f32 %v3746_v52, %v3876_v49 }
  0xb2   : > { %v1389_v56 = vsel %vm1366_vm1, %v1387_v10, %v1388_v30  ;;  %v1240_v38 = vadd.f32 %v1142_v44, %v994_v61  ;;  %v1879_v18 = vrot.slane %v1775_v48, 2  ;;  %v345_v21 = vmul.f32 %v3645_v2, %v3401_v45 }
  0xb3   : > { %v2032_v26 = vadd.f32 %v3808_v53, %v1994_v3  ;;  %v1635_v37 = vsel %vm1366_vm1, %v1633_v57, %v1634_v5  ;;  %v4948_v32 = vrot.slane %v3919_v20, 2  ;;  %v415_v23 = vmul.f32 %v3656_v33, %v3631_v24 }
  0xb4   : > { %v485_v36 = vmul.f32 %v3663_v35, %v3911_v4  ;;  %v1487_v17 = vadd.f32 %v1389_v56, %v1240_v38  ;;  %v567_v9 = vmul.f32 %v3670_v46, %v3401_v45  ;;  %v3936_v60 = vmul.f32 %v3670_v46, %v3439_v39 }
  0xb5   : > { %v2064_v58 = vmax.f32 %v2032_v26, 0.0  ;;  %v1881_v40 = vsel %vm1366_vm1, %v1879_v18, %v4948_v32  ;;  %v447_v62 = vadd.f32 %v415_v23, %v345_v21  ;;  %v814_v15 = vmul.f32 %v3684_v8, %v3631_v24 }
  0xb6   : > { %v3945_v51 = vmul.f32 %v3684_v8, %v3694_v55  ;;  %v1733_v29 = vadd.f32 %v1635_v37, %v1487_v17  ;;  %v688_v16 = vrot.slane %v567_v9, 1  ;;  %v4947_v41 = vrot.slane %v3936_v60, 1 }
  0xb7   : > { %2654 = vmatmul.mubr.msk.f32.gmra.mxu1 %vm2084_vm2, %v2064_v58  ;;  %v1060_v59 = vmul.f32 %v3700_v1, %v3911_v4  ;;  %v517_v10 = vadd.f32 %v485_v36, %v447_v62  ;;  %v934_v12 = vrot.slane %v814_v15, 1  ;;  %v3957_v61 = vmul.f32 %v3700_v1, %v3949_v27 }
  0xb8   : > { %v4946_v3 = vrot.slane %v3945_v51, 1  ;;  %v1979_v44 = vadd.f32 %v1881_v40, %v1733_v29  ;;  %v690_v48 = vsel %vm627_vm0, %v688_v16, %v4947_v41  ;;  %v1306_v57 = vmul.f32 %v3715_v31, %v3401_v45 }
  0xb9   : > { %v1180_v56 = vrot.slane %v1060_v59, 1  ;;  %v764_v26 = vadd.f32 %v690_v48, %v517_v10  ;;  %v4945_v18 = vrot.slane %v3957_v61, 1  ;;  %v3970_v21 = vmul.f32 %v3715_v31, %v3439_v39  ;;  %v3991_v59 = vld [vmem:[%s2832_s14 + $0xa0] sm:$0x3] }
  0xba   : > { %v936_v38 = vsel %vm627_vm0, %v934_v12, %v4946_v3  ;;  %v2017_v37 = vadd.f32 %v3808_v53, %v1979_v44  ;;  %v1427_v23 = vrot.slane %v1306_v57, 2  ;;  %v1553_v36 = vmul.f32 %v3731_v13, %v3631_v24 }
  0xbb   : > { %v3977_v45 = vmul.f32 %v3731_v13, %v3694_v55  ;;  %v1010_v58 = vadd.f32 %v936_v38, %v764_v26  ;;  %v1182_v17 = vsel %vm627_vm0, %v1180_v56, %v4945_v18  ;;  %v4944_v9 = vrot.slane %v3970_v21, 2 }
  0xbc   : > { %v1799_v40 = vmul.f32 %v3746_v52, %v3911_v4  ;;  %v2049_v62 = vmax.f32 %v2017_v37, 0.0  ;;  %v1673_v15 = vrot.slane %v1553_v36, 2  ;;  %v3988_v16 = vmul.f32 %v3746_v52, %v3949_v27 }
  0xbd   : > { %v4943_v29 = vrot.slane %v3977_v45, 2  ;;  %v1256_v10 = vadd.f32 %v1182_v17, %v1010_v58  ;;  %v1429_v12 = vsel %vm1366_vm1, %v1427_v23, %v4944_v9  ;;  %v330_v48 = vmul.f32 %v3645_v2, %v3366_v25 }
  0xbe   : > { %v1919_v44 = vrot.slane %v1799_v40, 2  ;;  %2632 = vmatprep.mubr.msk.f32.mxu0 %vm2084_vm2, %v2049_v62  ;;  %v1920_v57 = vrot.slane %v3988_v16, 2  ;;  %v400_v26 = vmul.f32 %v3656_v33, %v3596_v11  ;;  %v470_v38 = vmul.f32 %v3663_v35, %v3876_v49 }
  0xbf   : > { %v1675_v56 = vsel %vm1366_vm1, %v1673_v15, %v4943_v29  ;;  %v1503_v37 = vadd.f32 %v1429_v12, %v1256_v10  ;;  %v545_v23 = vmul.f32 %v3670_v46, %v3481_v43  ;;  %v792_v25 = vmul.f32 %v3684_v8, %v3756_v7 }
  0xc0   : > { %v1038_v36 = vmul.f32 %v3700_v1, %v3991_v59  ;;  %v1921_v58 = vsel %vm1366_vm1, %v1919_v44, %v1920_v57  ;;  %v432_v17 = vadd.f32 %v400_v26, %v330_v48  ;;  %v1284_v40 = vmul.f32 %v3715_v31, %v3481_v43 }
  0xc1   : > { %v1531_v62 = vmul.f32 %v3731_v13, %v3756_v7  ;;  %v1749_v15 = vadd.f32 %v1675_v56, %v1503_v37  ;;  %v651_v10 = vrot.slane %v545_v23, 1  ;;  %v897_v12 = vrot.slane %v792_v25, 1  ;;  %v4038_v37 = vld [vmem:[%s2832_s14 + $0x160] sm:$0x3] }
  0xc2   : > { %v1143_v29 = vrot.slane %v1038_v36, 1  ;;  %v502_v9 = vadd.f32 %v470_v38, %v432_v17  ;;  %v1390_v18 = vrot.slane %v1284_v40, 2  ;;  %v1777_v41 = vmul.f32 %v3746_v52, %v3991_v59 }
  0xc3   : > { %v1636_v3 = vrot.slane %v1531_v62, 2  ;;  %v1995_v32 = vadd.f32 %v1921_v58, %v1749_v15  ;;  %v652_v44 = vsel %vm627_vm0, %v649_v50, %v651_v10  ;;  %v898_v43 = vsel %vm627_vm0, %v895_v28, %v897_v12  ;;  %v4070_v12 = vld [vmem:[%s2832_s14 + $0xa8] sm:$0xff] }
  0xc4   : > { %v1144_v48 = vsel %vm627_vm0, %v1141_v6, %v1143_v29  ;;  %v749_v56 = vadd.f32 %v652_v44, %v502_v9  ;;  %v1391_v26 = vsel %vm1366_vm1, %v1388_v30, %v1390_v18  ;;  %v1882_v42 = vrot.slane %v1777_v41, 2 }
  0xc5   : > { %v1637_v38 = vsel %vm1366_vm1, %v1634_v5, %v1636_v3  ;;  %v2033_v63 = vadd.f32 %v3808_v53, %v1995_v32  ;;  %v346_v50 = vmul.f32 %v3645_v2, %v3439_v39  ;;  %v416_v28 = vmul.f32 %v3656_v33, %v3694_v55 }
  0xc6   : > { %v486_v34 = vmul.f32 %v3663_v35, %v3949_v27  ;;  %v995_v47 = vadd.f32 %v898_v43, %v749_v56  ;;  %v4979_v6 = vrot.slane %v3919_v20, 2  ;;  %v569_v22 = vmul.f32 %v3670_v46, %v3528_v54 }
  0xc7   : > { %v816_v5 = vmul.f32 %v3684_v8, %v3803_v19  ;;  %v2065_v32 = vmax.f32 %v2033_v63, 0.0  ;;  %v448_v41 = vadd.f32 %v416_v28, %v346_v50  ;;  %v1062_v39 = vmul.f32 %v3700_v1, %v4038_v37 }
  0xc8   : > { %v1883_v30 = vsel %vm1366_vm1, %v4979_v6, %v1882_v42  ;;  %v1308_v3 = vmul.f32 %v3715_v31, %v3528_v54  ;;  %v1241_v18 = vadd.f32 %v1144_v48, %v995_v47  ;;  %v691_v9 = vrot.slane %v569_v22, 1 }
  0xc9   : > { %v937_v20 = vrot.slane %v816_v5, 1  ;;  %v1555_v29 = vmul.f32 %v3731_v13, %v3803_v19  ;;  %2656 = vmatprep.mubr.msk.f32.mxu1 %vm2084_vm2, %v2065_v32  ;;  %v518_v23 = vadd.f32 %v486_v34, %v448_v41  ;;  %v1183_v25 = vrot.slane %v1062_v39, 1 }
  0xca   : > { %v1430_v36 = vrot.slane %v1308_v3, 2  ;;  %v1801_v58 = vmul.f32 %v3746_v52, %v4038_v37  ;;  %v1488_v17 = vadd.f32 %v1391_v26, %v1241_v18  ;;  %v4980_v40 = vrot.slane %v3936_v60, 1 }
  0xcb   : > { %v4981_v54 = vrot.slane %v3945_v51, 1  ;;  %v1676_v10 = vrot.slane %v1555_v29, 2  ;;  %v4982_v43 = vrot.slane %v3957_v61, 1  ;;  %v4983_v56 = vrot.slane %v3970_v21, 2 }
  0xcc   : > { %v692_v62 = vsel %vm627_vm0, %v4980_v40, %v691_v9  ;;  %v1922_v42 = vrot.slane %v1801_v58, 2  ;;  %v1734_v60 = vadd.f32 %v1637_v38, %v1488_v17  ;;  %v4984_v63 = vrot.slane %v3977_v45, 2 }
  0xcd   : > { %v938_v15 = vsel %vm627_vm0, %v4981_v54, %v937_v20  ;;  %v765_v44 = vadd.f32 %v692_v62, %v518_v23  ;;  %v1184_v48 = vsel %vm627_vm0, %v4982_v43, %v1183_v25  ;;  %v1431_v26 = vsel %vm1366_vm1, %v4983_v56, %v1430_v36 }
  0xce   : > { %v1677_v51 = vsel %vm1366_vm1, %v4984_v63, %v1676_v10  ;;  %v331_v50 = vmul.f32 %v3645_v2, %v3560_v14  ;;  %v401_v28 = vmul.f32 %v3656_v33, %v3840_v0  ;;  %v1923_v21 = vsel %vm1366_vm1, %v1920_v57, %v1922_v42 }
  0xcf   : > { %v1011_v61 = vadd.f32 %v938_v15, %v765_v44  ;;  %v471_v34 = vmul.f32 %v3663_v35, %v4070_v12  ;;  %v546_v45 = vmul.f32 %v3670_v46, %v3560_v14  ;;  %v1980_v38 = vadd.f32 %v1883_v30, %v1734_v60  ;;  %v4106_v30 = vld [vmem:[%s2832_s14 + $0xb0] sm:$0xff]  ;;  %v4141_v60 = vld [vmem:[%s2832_s14 + $0x168] sm:$0xff] }
  0xd0   : > { %v433_v47 = vadd.f32 %v401_v28, %v331_v50  ;;  %v4094_v6 = vmul.f32 %v3670_v46, %v3596_v11  ;;  %v793_v22 = vmul.f32 %v3684_v8, %v3840_v0  ;;  %v4100_v16 = vmul.f32 %v3684_v8, %v3876_v49 }
  0xd1   : > { %v1257_v5 = vadd.f32 %v1184_v48, %v1011_v61  ;;  %v653_v32 = vrot.slane %v546_v45, 1  ;;  %v1039_v57 = vmul.f32 %v3700_v1, %v4070_v12  ;;  %v2018_v41 = vadd.f32 %v3808_v53, %v1980_v38 }
  0xd2   : > { %v503_v39 = vadd.f32 %v471_v34, %v433_v47  ;;  %v654_v3 = vrot.slane %v4094_v6, 1  ;;  %v899_v18 = vrot.slane %v793_v22, 1  ;;  %v900_v20 = vrot.slane %v4100_v16, 1 }
  0xd3   : > { %v1504_v9 = vadd.f32 %v1431_v26, %v1257_v5  ;;  %v4112_v29 = vmul.f32 %v3700_v1, %v4106_v30  ;;  %v1145_v23 = vrot.slane %v1039_v57, 1  ;;  %v2050_v25 = vmax.f32 %v2018_v41, 0.0 }
  0xd4   : > { %v655_v36 = vsel %vm627_vm0, %v653_v32, %v654_v3  ;;  %v1285_v58 = vmul.f32 %v3715_v31, %v3560_v14  ;;  %v4121_v17 = vmul.f32 %v3715_v31, %v3596_v11  ;;  %v901_v54 = vsel %vm627_vm0, %v899_v18, %v900_v20 }
  0xd5   : > { %v1750_v40 = vadd.f32 %v1677_v51, %v1504_v9  ;;  %v750_v62 = vadd.f32 %v655_v36, %v503_v39  ;;  %v1146_v15 = vrot.slane %v4112_v29, 1  ;;  %2633 = vmatmul.mubr.msk.f32.gmra.mxu0 %vm2084_vm2, %v2050_v25  ;;  %v1532_v14 = vmul.f32 %v3731_v13, %v3840_v0 }
  0xd6   : > { %v1392_v10 = vrot.slane %v1285_v58, 2  ;;  %v1393_v44 = vrot.slane %v4121_v17, 2  ;;  %v4133_v43 = vmul.f32 %v3731_v13, %v3876_v49  ;;  %v1778_v42 = vmul.f32 %v3746_v52, %v4070_v12  ;;  %v4179_v58 = vld [vmem:[%s2832_s14 + $0x170] sm:$0xff] }
  0xd7   : > { %v1996_v48 = vadd.f32 %v1923_v21, %v1750_v40  ;;  %v996_v56 = vadd.f32 %v901_v54, %v750_v62  ;;  %v1147_v26 = vsel %vm627_vm0, %v1145_v23, %v1146_v15  ;;  %v1638_v51 = vrot.slane %v1532_v14, 2 }
  0xd8   : > { %v1394_v63 = vsel %vm1366_vm1, %v1392_v10, %v1393_v44  ;;  %v1639_v50 = vrot.slane %v4133_v43, 2  ;;  %v4149_v28 = vmul.f32 %v3746_v52, %v4106_v30  ;;  %v1884_v34 = vrot.slane %v1778_v42, 2 }
  0xd9   : > { %v2034_v61 = vadd.f32 %v3808_v53, %v1996_v48  ;;  %v1242_v21 = vadd.f32 %v1147_v26, %v996_v56  ;;  %v347_v45 = vmul.f32 %v3645_v2, %v3631_v24  ;;  %v417_v22 = vmul.f32 %v3656_v33, %v3911_v4 }
  0xda   : > { %v1640_v38 = vsel %vm1366_vm1, %v1638_v51, %v1639_v50  ;;  %v4954_v47 = vrot.slane %v4149_v28, 2  ;;  %v487_v5 = vmul.f32 %v3663_v35, %v4141_v60  ;;  %v570_v41 = vmul.f32 %v3670_v46, %v3631_v24 }
  0xdb   : > { %v2066_v32 = vmax.f32 %v2034_v61, 0.0  ;;  %v1489_v57 = vadd.f32 %v1394_v63, %v1242_v21  ;;  %v4166_v39 = vmul.f32 %v3670_v46, %v3694_v55  ;;  %v449_v9 = vadd.f32 %v417_v22, %v347_v45 }
  0xdc   : > { %v1886_v18 = vsel %vm1366_vm1, %v1884_v34, %v4954_v47  ;;  %v817_v23 = vmul.f32 %v3684_v8, %v3911_v4  ;;  %v4175_v25 = vmul.f32 %v3684_v8, %v3949_v27  ;;  %v693_v40 = vrot.slane %v570_v41, 1 }
  0xdd   : > { %2657 = vmatmul.mubr.msk.f32.gmra.mxu1 %vm2084_vm2, %v2066_v32  ;;  %v1735_v36 = vadd.f32 %v1640_v38, %v1489_v57  ;;  %v4953_v62 = vrot.slane %v4166_v39, 1  ;;  %v1063_v54 = vmul.f32 %v3700_v1, %v4141_v60  ;;  %v519_v10 = vadd.f32 %v487_v5, %v449_v9 }
  0xde   : > { %v939_v14 = vrot.slane %v817_v23, 1  ;;  %v4952_v48 = vrot.slane %v4175_v25, 1  ;;  %v4187_v56 = vmul.f32 %v3700_v1, %v4179_v58  ;;  %v1309_v51 = vmul.f32 %v3715_v31, %v3631_v24 }
  0xdf   : > { %v1981_v26 = vadd.f32 %v1886_v18, %v1735_v36  ;;  %v695_v42 = vsel %vm627_vm0, %v693_v40, %v4953_v62  ;;  %v1185_v63 = vrot.slane %v1063_v54, 1  ;;  %v4200_v45 = vmul.f32 %v3715_v31, %v3694_v55  ;;  %v4221_v54 = vld [vmem:[%s2832_s14 + $0xb8] sm:$0x3] }
  0xe0   : > { %v766_v61 = vadd.f32 %v695_v42, %v519_v10  ;;  %v941_v21 = vsel %vm627_vm0, %v939_v14, %v4952_v48  ;;  %v4951_v34 = vrot.slane %v4187_v56, 1  ;;  %v1432_v22 = vrot.slane %v1309_v51, 2 }
  0xe1   : > { %v2019_v38 = vadd.f32 %v3808_v53, %v1981_v26  ;;  %v1556_v5 = vmul.f32 %v3731_v13, %v3911_v4  ;;  %v4207_v24 = vmul.f32 %v3731_v13, %v3949_v27  ;;  %v4950_v41 = vrot.slane %v4200_v45, 2 }
  0xe2   : > { %v1012_v32 = vadd.f32 %v941_v21, %v766_v61  ;;  %v1187_v57 = vsel %vm627_vm0, %v1185_v63, %v4951_v34  ;;  %v1802_v18 = vmul.f32 %v3746_v52, %v4141_v60  ;;  %v4218_v40 = vmul.f32 %v3746_v52, %v4179_v58 }
  0xe3   : > { %v2051_v9 = vmax.f32 %v2019_v38, 0.0  ;;  %v1678_v23 = vrot.slane %v1556_v5, 2  ;;  %v4949_v36 = vrot.slane %v4207_v24, 2  ;;  %v1434_v14 = vsel %vm1366_vm1, %v1432_v22, %v4950_v41 }
  0xe4   : > { %v1258_v10 = vadd.f32 %v1187_v57, %v1012_v32  ;;  %v1924_v26 = vrot.slane %v1802_v18, 2  ;;  %v332_v42 = vmul.f32 %v3645_v2, %v3596_v11  ;;  %v1925_v51 = vrot.slane %v4218_v40, 2 }
  0xe5   : > { %2635 = vmatprep.mubr.msk.f32.mxu0 %vm2084_vm2, %v2051_v9  ;;  %v1680_v63 = vsel %vm1366_vm1, %v1678_v23, %v4949_v36  ;;  %v402_v61 = vmul.f32 %v3656_v33, %v3876_v49  ;;  %v472_v21 = vmul.f32 %v3663_v35, %v4106_v30  ;;  %v548_v22 = vmul.f32 %v3670_v46, %v3756_v7 }
  0xe6   : > { %v1505_v38 = vadd.f32 %v1434_v14, %v1258_v10  ;;  %v795_v11 = vmul.f32 %v3684_v8, %v3991_v59  ;;  %v1041_v5 = vmul.f32 %v3700_v1, %v4221_v54  ;;  %v1926_v32 = vsel %vm1366_vm1, %v1924_v26, %v1925_v51 }
  0xe7   : > { %v434_v57 = vadd.f32 %v402_v61, %v332_v42  ;;  %v1287_v18 = vmul.f32 %v3715_v31, %v3756_v7  ;;  %v1534_v9 = vmul.f32 %v3731_v13, %v3991_v59  ;;  %v656_v10 = vrot.slane %v548_v22, 1 }
  0xe8   : > { %v1751_v23 = vadd.f32 %v1680_v63, %v1505_v38  ;;  %v902_v14 = vrot.slane %v795_v11, 1  ;;  %v1148_v36 = vrot.slane %v1041_v5, 1  ;;  %v1780_v62 = vmul.f32 %v3746_v52, %v4221_v54  ;;  %v4268_v38 = vld [vmem:[%s2832_s14 + $0x178] sm:$0x3] }
  0xe9   : > { %v504_v41 = vadd.f32 %v472_v21, %v434_v57  ;;  %v1395_v34 = vrot.slane %v1287_v18, 2  ;;  %v1641_v48 = vrot.slane %v1534_v9, 2  ;;  %v657_v26 = vsel %vm627_vm0, %v654_v3, %v656_v10 }
  0xea   : > { %v1997_v47 = vadd.f32 %v1926_v32, %v1751_v23  ;;  %v903_v7 = vsel %vm627_vm0, %v900_v20, %v902_v14  ;;  %v1149_v42 = vsel %vm627_vm0, %v1146_v15, %v1148_v36  ;;  %v1887_v6 = vrot.slane %v1780_v62, 2 }
  0xeb   : > { %v751_v63 = vadd.f32 %v657_v26, %v504_v41  ;;  %v1396_v61 = vsel %vm1366_vm1, %v1393_v44, %v1395_v34  ;;  %v1642_v21 = vsel %vm1366_vm1, %v1639_v50, %v1641_v48  ;;  %v348_v3 = vmul.f32 %v3645_v2, %v3694_v55 }
  0xec   : > { %v2035_v16 = vadd.f32 %v3808_v53, %v1997_v47  ;;  %v418_v20 = vmul.f32 %v3656_v33, %v3949_v27  ;;  %v488_v29 = vmul.f32 %v3663_v35, %v4179_v58  ;;  %v4985_v15 = vrot.slane %v4149_v28, 2 }
  0xed   : > { %v997_v17 = vadd.f32 %v903_v7, %v751_v63  ;;  %v572_v43 = vmul.f32 %v3670_v46, %v3803_v19  ;;  %v819_v50 = vmul.f32 %v3684_v8, %v4038_v37  ;;  %v1065_v55 = vmul.f32 %v3700_v1, %v4268_v38 }
  0xee   : > { %v1888_v44 = vsel %vm1366_vm1, %v4985_v15, %v1887_v6  ;;  %v2067_v47 = vmax.f32 %v2035_v16, 0.0  ;;  %v450_v62 = vadd.f32 %v418_v20, %v348_v3  ;;  %v1311_v48 = vmul.f32 %v3715_v31, %v3803_v19 }
  0xef   : > { %v1243_v34 = vadd.f32 %v1149_v42, %v997_v17  ;;  %v696_v41 = vrot.slane %v572_v43, 1  ;;  %v942_v36 = vrot.slane %v819_v50, 1  ;;  %v1558_v28 = vmul.f32 %v3731_v13, %v4038_v37 }
  0xf0   : > { %2659 = vmatprep.mubr.msk.f32.mxu1 %vm2084_vm2, %v2067_v47  ;;  %v520_v22 = vadd.f32 %v488_v29, %v450_v62  ;;  %v1188_v11 = vrot.slane %v1065_v55, 1  ;;  %v1435_v5 = vrot.slane %v1311_v48, 2  ;;  %v1804_v32 = vmul.f32 %v3746_v52, %v4268_v38 }
  0xf1   : > { %v1490_v57 = vadd.f32 %v1396_v61, %v1243_v34  ;;  %v4986_v18 = vrot.slane %v4166_v39, 1  ;;  %v4987_v9 = vrot.slane %v4175_v25, 1  ;;  %v1681_v10 = vrot.slane %v1558_v28, 2 }
  0xf2   : > { %v4988_v26 = vrot.slane %v4187_v56, 1  ;;  %v4989_v42 = vrot.slane %v4200_v45, 2  ;;  %v1927_v6 = vrot.slane %v1804_v32, 2  ;;  %v4990_v39 = vrot.slane %v4207_v24, 2  ;;  %v4316_v45 = vld [vmem:[%s2832_s14 + $0xc0] sm:$0xff] }
  0xf3   : > { %v697_v19 = vsel %vm627_vm0, %v4986_v18, %v696_v41  ;;  %v943_v23 = vsel %vm627_vm0, %v4987_v9, %v942_v36  ;;  %v1736_v61 = vadd.f32 %v1642_v21, %v1490_v57  ;;  %v333_v25 = vmul.f32 %v3645_v2, %v3840_v0  ;;  %v4338_v36 = vld [vmem:[%s2832_s14 + $0xc8] sm:$0xff] }
  0xf4   : > { %v767_v14 = vadd.f32 %v697_v19, %v520_v22  ;;  %v1189_v7 = vsel %vm627_vm0, %v4988_v26, %v1188_v11  ;;  %v1436_v63 = vsel %vm1366_vm1, %v4989_v42, %v1435_v5  ;;  %v1682_v16 = vsel %vm1366_vm1, %v4990_v39, %v1681_v10 }
  0xf5   : > { %v403_v3 = vmul.f32 %v3656_v33, %v4070_v12  ;;  %v1928_v56 = vsel %vm1366_vm1, %v1925_v51, %v1927_v6  ;;  %v473_v21 = vmul.f32 %v4316_v45, %v3663_v35  ;;  %v549_v24 = vmul.f32 %v3670_v46, %v3840_v0 }
  0xf6   : > { %v1013_v20 = vadd.f32 %v943_v23, %v767_v14  ;;  %v1982_v29 = vadd.f32 %v1888_v44, %v1736_v61  ;;  %v4324_v15 = vmul.f32 %v3670_v46, %v3876_v49  ;;  %v796_v40 = vmul.f32 %v3684_v8, %v4070_v12  ;;  %v4371_v61 = vld [vmem:[%s2832_s14 + $0x180] sm:$0xff] }
  0xf7   : > { %v435_v17 = vadd.f32 %v403_v3, %v333_v25  ;;  %v658_v51 = vrot.slane %v549_v24, 1  ;;  %v4330_v50 = vmul.f32 %v3684_v8, %v4106_v30  ;;  %v1042_v47 = vmul.f32 %v4316_v45, %v3700_v1 }
  0xf8   : > { %v1259_v43 = vadd.f32 %v1189_v7, %v1013_v20  ;;  %v2020_v62 = vadd.f32 %v3808_v53, %v1982_v29  ;;  %v659_v55 = vrot.slane %v4324_v15, 1  ;;  %v904_v48 = vrot.slane %v796_v40, 1 }
  0xf9   : > { %v505_v44 = vadd.f32 %v473_v21, %v435_v17  ;;  %v905_v41 = vrot.slane %v4330_v50, 1  ;;  %v4342_v28 = vmul.f32 %v4338_v36, %v3700_v1  ;;  %v1150_v22 = vrot.slane %v1042_v47, 1 }
  0xfa   : > { %v1506_v34 = vadd.f32 %v1436_v63, %v1259_v43  ;;  %v2052_v11 = vmax.f32 %v2020_v62, 0.0  ;;  %v660_v5 = vsel %vm627_vm0, %v658_v51, %v659_v55  ;;  %v1288_v32 = vmul.f32 %v3715_v31, %v3840_v0 }
  0xfb   : > { %v4351_v57 = vmul.f32 %v3715_v31, %v3876_v49  ;;  %v752_v19 = vadd.f32 %v660_v5, %v505_v44  ;;  %v906_v9 = vsel %vm627_vm0, %v904_v48, %v905_v41  ;;  %v1151_v23 = vrot.slane %v4342_v28, 1 }
  0xfc   : > { %v1752_v18 = vadd.f32 %v1682_v16, %v1506_v34  ;;  %2636 = vmatmul.mubr.msk.f32.gmra.mxu0 %vm2084_vm2, %v2052_v11  ;;  %v1397_v10 = vrot.slane %v1288_v32, 2  ;;  %v1535_v0 = vmul.f32 %v3731_v13, %v4070_v12  ;;  %v4363_v26 = vmul.f32 %v3731_v13, %v4106_v30 }
  0xfd   : > { %v1398_v14 = vrot.slane %v4351_v57, 2  ;;  %v998_v42 = vadd.f32 %v906_v9, %v752_v19  ;;  %v1152_v63 = vsel %vm627_vm0, %v1150_v22, %v1151_v23  ;;  %v1781_v6 = vmul.f32 %v4316_v45, %v3746_v52  ;;  %v4409_v22 = vld [vmem:[%s2832_s14 + $0x188] sm:$0xff] }
  0xfe   : > { %v1998_v7 = vadd.f32 %v1928_v56, %v1752_v18  ;;  %v1643_v16 = vrot.slane %v1535_v0, 2  ;;  %v1644_v25 = vrot.slane %v4363_v26, 2  ;;  %v4379_v3 = vmul.f32 %v4338_v36, %v3746_v52 }
  0xff   : > { %v1399_v39 = vsel %vm1366_vm1, %v1397_v10, %v1398_v14  ;;  %v1244_v56 = vadd.f32 %v1152_v63, %v998_v42  ;;  %v1889_v21 = vrot.slane %v1781_v6, 2  ;;  %v349_v24 = vmul.f32 %v3645_v2, %v3911_v4 }
 0x100   : > { %v2036_v20 = vadd.f32 %v3808_v53, %v1998_v7  ;;  %v1645_v29 = vsel %vm1366_vm1, %v1643_v16, %v1644_v25  ;;  %v1890_v17 = vrot.slane %v4379_v3, 2  ;;  %v419_v40 = vmul.f32 %v3656_v33, %v4141_v60  ;;  %v4549_v3 = vld [vmem:[%s4919_s1 + $0x2] ss:$0 sm:$0xff] }
 0x101   : > { %v489_v43 = vmul.f32 %v3663_v35, %v4371_v61  ;;  %v1491_v47 = vadd.f32 %v1399_v39, %v1244_v56  ;;  %v573_v62 = vmul.f32 %v3670_v46, %v3911_v4  ;;  %v4396_v2 = vmul.f32 %v3670_v46, %v3949_v27 }
 0x102   : > { %v2068_v51 = vmax.f32 %v2036_v20, 0.0  ;;  %v1891_v44 = vsel %vm1366_vm1, %v1889_v21, %v1890_v17  ;;  %v451_v48 = vadd.f32 %v419_v40, %v349_v24  ;;  %v820_v33 = vmul.f32 %v3684_v8, %v4141_v60 }
 0x103   : > { %v4405_v35 = vmul.f32 %v3684_v8, %v4179_v58  ;;  %v1737_v34 = vadd.f32 %v1645_v29, %v1491_v47  ;;  %v698_v11 = vrot.slane %v573_v62, 1  ;;  %v4959_v46 = vrot.slane %v4396_v2, 1 }
 0x104   : > { %2660 = vmatmul.mubr.msk.f32.gmra.mxu1 %vm2084_vm2, %v2068_v51  ;;  %v1066_v5 = vmul.f32 %v3700_v1, %v4371_v61  ;;  %v521_v32 = vadd.f32 %v489_v43, %v451_v48  ;;  %v944_v18 = vrot.slane %v820_v33, 1  ;;  %v4417_v9 = vmul.f32 %v3700_v1, %v4409_v22 }
 0x105   : > { %v4958_v19 = vrot.slane %v4405_v35, 1  ;;  %v1983_v8 = vadd.f32 %v1891_v44, %v1737_v34  ;;  %v700_v10 = vsel %vm627_vm0, %v698_v11, %v4959_v46  ;;  %v1312_v7 = vmul.f32 %v3715_v31, %v3911_v4  ;;  %v4456_v34 = vld [vmem:[%s4919_s1] ss:$0 sm:$0xff] }
 0x106   : > { %v1190_v0 = vrot.slane %v1066_v5, 1  ;;  %v768_v42 = vadd.f32 %v700_v10, %v521_v32  ;;  %v4957_v6 = vrot.slane %v4417_v9, 1  ;;  %v4430_v39 = vmul.f32 %v3715_v31, %v3949_v27 }
 0x107   : > { %v946_v63 = vsel %vm627_vm0, %v944_v18, %v4958_v19  ;;  %v2021_v16 = vadd.f32 %v3808_v53, %v1983_v8  ;;  %v1437_v20 = vrot.slane %v1312_v7, 2  ;;  %v1559_v56 = vmul.f32 %v3731_v13, %v4141_v60  ;;  %v4468_v18 = vld [vmem:[%s4919_s1 + $0x3] ss:$0 sm:$0xff]  ;;  %v4482_v7 = vld [vmem:[%s4919_s1 + $0x1] ss:$0 sm:$0xff] }
 0x108   : > { %v4437_v4 = vmul.f32 %v3731_v13, %v4179_v58  ;;  %v1014_v21 = vadd.f32 %v946_v63, %v768_v42  ;;  %v1192_v24 = vsel %vm627_vm0, %v1190_v0, %v4957_v6  ;;  %v4956_v29 = vrot.slane %v4430_v39, 2  ;;  %v4489_v63 = vld [vmem:[%s4919_s1 + $0x4] ss:$0 sm:$0xff] }
 0x109   : > { %v1805_v40 = vmul.f32 %v3746_v52, %v4371_v61  ;;  %v2053_v43 = vmax.f32 %v2021_v16, 0.0  ;;  %v1683_v51 = vrot.slane %v1559_v56, 2  ;;  %v4448_v62 = vmul.f32 %v3746_v52, %v4409_v22 }
 0x10a   : > { %v4955_v47 = vrot.slane %v4437_v4, 2  ;;  %v1260_v44 = vadd.f32 %v1192_v24, %v1014_v21  ;;  %v1439_v48 = vsel %vm1366_vm1, %v1437_v20, %v4956_v29  ;;  %v334_v11 = vmul.f32 %v4456_v34, %v3876_v49  ;;  %v4475_v49 = vld [vmem:[%s4919_s1 + $0x6] ss:$0 sm:$0xff]  ;;  %v4494_v20 = vld [vmem:[%s2832_s14 + $0xd0] sm:$0x3] }
 0x10b   : > { %v1929_v33 = vrot.slane %v1805_v40, 2  ;;  %2638 = vmatprep.mubr.msk.f32.mxu0 %vm2084_vm2, %v2053_v43  ;;  %v1930_v32 = vrot.slane %v4448_v62, 2  ;;  %v404_v8 = vmul.f32 %v4468_v18, %v4106_v30  ;;  %v474_v10 = vmul.f32 %v4475_v49, %v4338_v36 }
 0x10c   : > { %v1685_v5 = vsel %vm1366_vm1, %v1683_v51, %v4955_v47  ;;  %v1507_v0 = vadd.f32 %v1439_v48, %v1260_v44  ;;  %v551_v42 = vmul.f32 %v4482_v7, %v3991_v59  ;;  %v798_v16 = vmul.f32 %v4489_v63, %v4221_v54 }
 0x10d   : > { %v1044_v56 = vmul.f32 %v4494_v20, %v3700_v1  ;;  %v1931_v21 = vsel %vm1366_vm1, %v1929_v33, %v1930_v32  ;;  %v436_v24 = vadd.f32 %v404_v8, %v334_v11  ;;  %v1290_v40 = vmul.f32 %v3715_v31, %v3991_v59 }
 0x10e   : > { %v1537_v43 = vmul.f32 %v3731_v13, %v4221_v54  ;;  %v1753_v51 = vadd.f32 %v1685_v5, %v1507_v0  ;;  %v661_v44 = vrot.slane %v551_v42, 1  ;;  %v907_v48 = vrot.slane %v798_v16, 1  ;;  %v4523_v5 = vld [vmem:[%s2832_s14 + $0x190] sm:$0x3] }
 0x10f   : > { %v1153_v47 = vrot.slane %v1044_v56, 1  ;;  %v506_v29 = vadd.f32 %v474_v10, %v436_v24  ;;  %v1400_v6 = vrot.slane %v1290_v40, 2  ;;  %v1783_v1 = vmul.f32 %v4494_v20, %v3746_v52 }
 0x110   : > { %v1646_v19 = vrot.slane %v1537_v43, 2  ;;  %v1999_v46 = vadd.f32 %v1931_v21, %v1753_v51  ;;  %v662_v33 = vsel %vm627_vm0, %v659_v55, %v661_v44  ;;  %v908_v31 = vsel %vm627_vm0, %v905_v41, %v907_v48 }
 0x111   : > { %v1154_v13 = vsel %vm627_vm0, %v1151_v23, %v1153_v47  ;;  %v753_v59 = vadd.f32 %v662_v33, %v506_v29  ;;  %v1401_v11 = vsel %vm1366_vm1, %v1398_v14, %v1400_v6  ;;  %v1892_v15 = vrot.slane %v1783_v1, 2  ;;  %v4556_v47 = vld [vmem:[%s4919_s1 + $0x5] ss:$0 sm:$0xff] }
 0x112   : > { %v1647_v52 = vsel %vm1366_vm1, %v1644_v25, %v1646_v19  ;;  %v2037_v50 = vadd.f32 %v3808_v53, %v1999_v46  ;;  %v350_v55 = vmul.f32 %v4456_v34, %v3949_v27  ;;  %v420_v41 = vmul.f32 %v4468_v18, %v4179_v58  ;;  %v4542_v27 = vld [vmem:[%s4919_s1 + $0x7] ss:$0 sm:$0xff] }
 0x113   : > { %v490_v28 = vmul.f32 %v4475_v49, %v4409_v22  ;;  %v999_v57 = vadd.f32 %v908_v31, %v753_v59  ;;  %v1893_v23 = vsel %vm1366_vm1, %v1890_v17, %v1892_v15  ;;  %v575_v14 = vmul.f32 %v4482_v7, %v4038_v37 }
 0x114   : > { %v822_v53 = vmul.f32 %v4489_v63, %v4268_v38  ;;  %v2069_v26 = vmax.f32 %v2037_v50, 0.0  ;;  %v452_v25 = vadd.f32 %v420_v41, %v350_v55  ;;  %v1068_v46 = vmul.f32 %v4542_v27, %v4523_v5 }
 0x115   : > { %v1314_v17 = vmul.f32 %v4549_v3, %v4038_v37  ;;  %v1245_v19 = vadd.f32 %v1154_v13, %v999_v57  ;;  %v701_v6 = vrot.slane %v575_v14, 1  ;;  %v1561_v8 = vmul.f32 %v4556_v47, %v4268_v38  ;;  %v4564_v37 = vld [vmem:[%s4919_s1 + $0x8] ss:$0 sm:$0xff] }
 0x116   : > { %v947_v29 = vrot.slane %v822_v53, 1  ;;  %2662 = vmatprep.mubr.msk.f32.mxu1 %vm2084_vm2, %v2069_v26  ;;  %v522_v10 = vadd.f32 %v490_v28, %v452_v25  ;;  %v1193_v0 = vrot.slane %v1068_v46, 1  ;;  %v1807_v16 = vmul.f32 %v4564_v37, %v4523_v5 }
 0x117   : > { %v1440_v42 = vrot.slane %v1314_v17, 2  ;;  %v1492_v56 = vadd.f32 %v1401_v11, %v1245_v19  ;;  %v4991_v21 = vrot.slane %v4396_v2, 1  ;;  %v4992_v40 = vrot.slane %v4405_v35, 1 }
 0x118   : > { %v1686_v51 = vrot.slane %v1561_v8, 2  ;;  %v4993_v48 = vrot.slane %v4417_v9, 1  ;;  %v4994_v33 = vrot.slane %v4430_v39, 2  ;;  %v1932_v13 = vrot.slane %v1807_v16, 2  ;;  %v2723_v39 = vld [vmem:[%s2832_s14 + $0xd8] sm:$0xff] }
 0x119   : > { %v702_v24 = vsel %vm627_vm0, %v4991_v21, %v701_v6  ;;  %v948_v43 = vsel %vm627_vm0, %v4992_v40, %v947_v29  ;;  %v1738_v59 = vadd.f32 %v1647_v52, %v1492_v56  ;;  %v4995_v2 = vrot.slane %v4437_v4, 2  ;;  %v4614_v29 = vld [vmem:[%s2832_s14 + $0xe0] sm:$0xff] }
 0x11a   : > { %v769_v44 = vadd.f32 %v702_v24, %v522_v10  ;;  %v1194_v1 = vsel %vm627_vm0, %v4993_v48, %v1193_v0  ;;  %v1441_v31 = vsel %vm1366_vm1, %v4994_v33, %v1440_v42  ;;  %v335_v35 = vmul.f32 %v4456_v34, %v4070_v12 }
 0x11b   : > { %v1687_v11 = vsel %vm1366_vm1, %v4995_v2, %v1686_v51  ;;  %v405_v15 = vmul.f32 %v4468_v18, %v4316_v45  ;;  %v1933_v9 = vsel %vm1366_vm1, %v1930_v32, %v1932_v13  ;;  %v475_v55 = vmul.f32 %v2723_v39, %v4475_v49 }
 0x11c   : > { %v1015_v50 = vadd.f32 %v948_v43, %v769_v44  ;;  %v552_v52 = vmul.f32 %v4482_v7, %v4070_v12  ;;  %v1984_v4 = vadd.f32 %v1893_v23, %v1738_v59  ;;  %v4596_v28 = vmul.f32 %v4482_v7, %v4106_v30  ;;  %v4608_v23 = vld [vmem:[%s4920_s2] ss:$0 sm:$0xff]  ;;  %v302_v59 = vld [vmem:[%s2832_s14 + $0x198] sm:$0xff] }
 0x11d   : > { %v437_v41 = vadd.f32 %v405_v15, %v335_v35  ;;  %v799_v57 = vmul.f32 %v4489_v63, %v4316_v45  ;;  %v4602_v32 = vmul.f32 %v4489_v63, %v4338_v36  ;;  %v1045_v53 = vmul.f32 %v2723_v39, %v4542_v27 }
 0x11e   : > { %v1261_v14 = vadd.f32 %v1194_v1, %v1015_v50  ;;  %v663_v62 = vrot.slane %v552_v52, 1  ;;  %v2022_v26 = vadd.f32 %v4608_v23, %v1984_v4  ;;  %v664_v46 = vrot.slane %v4596_v28, 1 }
 0x11f   : > { %v507_v25 = vadd.f32 %v475_v55, %v437_v41  ;;  %v909_v17 = vrot.slane %v799_v57, 1  ;;  %v910_v6 = vrot.slane %v4602_v32, 1  ;;  %v4618_v8 = vmul.f32 %v4614_v29, %v4542_v27 }
 0x120   : > { %v1508_v19 = vadd.f32 %v1441_v31, %v1261_v14  ;;  %v1155_v10 = vrot.slane %v1045_v53, 1  ;;  %v2054_v0 = vmax.f32 %v2022_v26, 0.0  ;;  %v665_v42 = vsel %vm627_vm0, %v663_v62, %v664_v46 }
 0x121   : > { %v1291_v16 = vmul.f32 %v4549_v3, %v4070_v12  ;;  %v4627_v56 = vmul.f32 %v4549_v3, %v4106_v30  ;;  %v754_v24 = vadd.f32 %v665_v42, %v507_v25  ;;  %v911_v40 = vsel %vm627_vm0, %v909_v17, %v910_v6 }
 0x122   : > { %v1754_v21 = vadd.f32 %v1687_v11, %v1508_v19  ;;  %v1156_v43 = vrot.slane %v4618_v8, 1  ;;  %2639 = vmatmul.mubr.msk.f32.gmra.mxu0 %vm2084_vm2, %v2054_v0  ;;  %v1538_v12 = vmul.f32 %v4556_v47, %v4316_v45  ;;  %v4639_v48 = vmul.f32 %v4556_v47, %v4338_v36 }
 0x123   : > { %v1402_v51 = vrot.slane %v1291_v16, 2  ;;  %v1403_v44 = vrot.slane %v4627_v56, 2  ;;  %v1000_v33 = vadd.f32 %v911_v40, %v754_v24  ;;  %v1784_v13 = vmul.f32 %v2723_v39, %v4564_v37 }
 0x124   : > { %v2000_v1 = vadd.f32 %v1933_v9, %v1754_v21  ;;  %v1157_v31 = vsel %vm627_vm0, %v1155_v10, %v1156_v43  ;;  %v1648_v11 = vrot.slane %v1538_v12, 2  ;;  %v1649_v45 = vrot.slane %v4639_v48, 2  ;;  %v303_v10 = vld [vmem:[%s2832_s14 + $0x1a0] sm:$0xff] }
 0x125   : > { %v1404_v2 = vsel %vm1366_vm1, %v1402_v51, %v1403_v44  ;;  %v4652_v35 = vmul.f32 %v4614_v29, %v4564_v37  ;;  %v1246_v50 = vadd.f32 %v1157_v31, %v1000_v33  ;;  %v1894_v9 = vrot.slane %v1784_v13, 2 }
 0x126   : > { %v2038_v15 = vadd.f32 %v4608_v23, %v2000_v1  ;;  %v351_v39 = vmul.f32 %v4456_v34, %v4141_v60  ;;  %v1650_v55 = vsel %vm1366_vm1, %v1648_v11, %v1649_v45  ;;  %v421_v4 = vmul.f32 %v4468_v18, %v4371_v61 }
 0x127   : > { %v1895_v52 = vrot.slane %v4652_v35, 2  ;;  %v491_v41 = vmul.f32 %v4475_v49, %v302_v59  ;;  %v1493_v14 = vadd.f32 %v1404_v2, %v1246_v50  ;;  %v576_v62 = vmul.f32 %v4482_v7, %v4141_v60 }
 0x128   : > { %v2070_v57 = vmax.f32 %v2038_v15, 0.0  ;;  %v453_v26 = vadd.f32 %v421_v4, %v351_v39  ;;  %v4671_v25 = vmul.f32 %v4482_v7, %v4179_v58  ;;  %v823_v17 = vmul.f32 %v4489_v63, %v4371_v61 }
 0x129   : > { %v1896_v53 = vsel %vm1366_vm1, %v1894_v9, %v1895_v52  ;;  %v1739_v19 = vadd.f32 %v1650_v55, %v1493_v14  ;;  %v703_v0 = vrot.slane %v576_v62, 1  ;;  %v4679_v42 = vmul.f32 %v4489_v63, %v4409_v22 }
 0x12a   : > { %2663 = vmatmul.mubr.msk.f32.gmra.mxu1 %vm2084_vm2, %v2070_v57  ;;  %v1069_v16 = vmul.f32 %v4542_v27, %v302_v59  ;;  %v523_v21 = vadd.f32 %v491_v41, %v453_v26  ;;  %v704_v24 = vrot.slane %v4671_v25, 1  ;;  %v949_v40 = vrot.slane %v823_v17, 1 }
 0x12b   : > { %v4684_v51 = vmul.f32 %v4542_v27, %v303_v10  ;;  %v1985_v12 = vadd.f32 %v1896_v53, %v1739_v19  ;;  %v950_v1 = vrot.slane %v4679_v42, 1  ;;  %v1315_v31 = vmul.f32 %v4549_v3, %v4141_v60 }
 0x12c   : > { %v1195_v33 = vrot.slane %v1069_v16, 1  ;;  %v705_v13 = vsel %vm627_vm0, %v703_v0, %v704_v24  ;;  %v4695_v11 = vmul.f32 %v4549_v3, %v4179_v58  ;;  %v1562_v15 = vmul.f32 %v4556_v47, %v4371_v61 }
 0x12d   : > { %v1196_v2 = vrot.slane %v4684_v51, 1  ;;  %v2023_v50 = vadd.f32 %v4608_v23, %v1985_v12  ;;  %v770_v9 = vadd.f32 %v705_v13, %v523_v21  ;;  %v951_v60 = vsel %vm627_vm0, %v949_v40, %v950_v1 }
 0x12e   : > { %v1442_v39 = vrot.slane %v1315_v31, 2  ;;  %v1443_v4 = vrot.slane %v4695_v11, 2  ;;  %v4709_v41 = vmul.f32 %v4556_v47, %v4409_v22  ;;  %v1688_v57 = vrot.slane %v1562_v15, 2  ;;  %v2726_v15 = vld [vmem:[%s2832_s14 + $0xe8] sm:$0x3] }
 0x12f   : > { %v1197_v55 = vsel %vm627_vm0, %v1195_v33, %v1196_v2  ;;  %v2055_v61 = vmax.f32 %v2023_v50, 0.0  ;;  %v1016_v14 = vadd.f32 %v951_v60, %v770_v9  ;;  %v1808_v62 = vmul.f32 %v4564_v37, %v302_v59  ;;  %v2622_v9 = vpop.f32.mrf.mxu0  ;;  %v2646_v60 = vpop.f32.mrf.mxu1 }
 0x130   : > { %v4713_v53 = vmul.f32 %v4564_v37, %v303_v10  ;;  %v1444_v26 = vsel %vm1366_vm1, %v1442_v39, %v1443_v4  ;;  %v1689_v17 = vrot.slane %v4709_v41, 2  ;;  %v336_v19 = vmul.f32 %v4456_v34, %v4106_v30 }
 0x131   : > { %v406_v0 = vmul.f32 %v4468_v18, %v4338_v36  ;;  %2641 = vmatprep.mubr.msk.f32.mxu0 %vm2084_vm2, %v2055_v61  ;;  %v1262_v16 = vadd.f32 %v1197_v55, %v1016_v14  ;;  %v1934_v59 = vrot.slane %v1808_v62, 2  ;;  %v476_v40 = vmul.f32 %v4614_v29, %v4475_v49 }
 0x132   : > { %v1935_v21 = vrot.slane %v4713_v53, 2  ;;  %v1690_v12 = vsel %vm1366_vm1, %v1688_v57, %v1689_v17  ;;  %v554_v30 = vmul.f32 %v4482_v7, %v4221_v54  ;;  %v801_v36 = vmul.f32 %v4494_v20, %v4489_v63 }
 0x133   : > { %v438_v33 = vadd.f32 %v406_v0, %v336_v19  ;;  %v1509_v31 = vadd.f32 %v1444_v26, %v1262_v16  ;;  %v1047_v29 = vmul.f32 %v2726_v15, %v4542_v27  ;;  %v1293_v50 = vmul.f32 %v4549_v3, %v4221_v54 }
 0x134   : > { %v1936_v13 = vsel %vm1366_vm1, %v1934_v59, %v1935_v21  ;;  %v666_v55 = vrot.slane %v554_v30, 1  ;;  %v912_v57 = vrot.slane %v801_v36, 1  ;;  %v1540_v61 = vmul.f32 %v4556_v47, %v4494_v20  ;;  %v304_v59 = vld [vmem:[%s2832_s14 + $0x1a8] sm:$0x3]  ;;  %v2247_v30 = vpop.f32.mrf.mxu0  ;;  %s2575_s14 = sshll.u32 %s5001_s18, 8 }
 0x135   : > { %v508_v39 = vadd.f32 %v476_v40, %v438_v33  ;;  %v1755_v14 = vadd.f32 %v1690_v12, %v1509_v31  ;;  %v1158_v62 = vrot.slane %v1047_v29, 1  ;;  %v1405_v26 = vrot.slane %v1293_v50, 2  ;;  %s4792_s11 = scalar_lea.vmem %s4923_s5, %s2575_s14 }
 0x136   : > { %v1786_v19 = vmul.f32 %v2726_v15, %v4564_v37  ;;  %v667_v0 = vsel %vm627_vm0, %v664_v46, %v666_v55  ;;  %v913_v54 = vsel %vm627_vm0, %v910_v6, %v912_v57  ;;  %v1651_v16 = vrot.slane %v1540_v61, 2  ;;  %v2327_v46 = vpop.f32.mrf.mxu1 }
 0x137   : > { %v352_v40 = vmul.f32 %v4456_v34, %v4179_v58  ;;  %v492_v20 = vmul.f32 %v4475_v49, %v303_v10  ;;  %v2001_v12 = vadd.f32 %v1936_v13, %v1755_v14  ;;  %v755_v33 = vadd.f32 %v667_v0, %v508_v39  ;;  %v2625_v13 = vpop.f32.mrf.mxu0 }
 0x138   : > { %v1159_v28 = vsel %vm627_vm0, %v1156_v43, %v1158_v62  ;;  %v1406_v32 = vsel %vm1366_vm1, %v1403_v44, %v1405_v26  ;;  %v1652_v6 = vsel %vm1366_vm1, %v1649_v45, %v1651_v16  ;;  %v422_v58 = vmul.f32 %v4468_v18, %v4409_v22 }
 0x139   : > { %v578_v34 = vmul.f32 %v4482_v7, %v4268_v38  ;;  %v2039_v49 = vadd.f32 %v4608_v23, %v2001_v12  ;;  %v1001_v8 = vadd.f32 %v913_v54, %v755_v33  ;;  %v825_v43 = vmul.f32 %v4489_v63, %v4523_v5  ;;  %v4777_v7 = vld [vmem:[%s4922_s4] ss:$0 sm:$0xff]  ;;  %v2649_v63 = vpop.f32.mrf.mxu1  ;;  %v2257_v55 = vpop.f32.mrf.mxu0 }
 0x13a   : > { %v1071_v56 = vmul.f32 %v4542_v27, %v304_v59  ;;  %v1897_v10 = vrot.slane %v1786_v19, 2  ;;  %v454_v44 = vadd.f32 %v422_v58, %v352_v40  ;;  %v1317_v48 = vmul.f32 %v4549_v3, %v4268_v38 }
 0x13b   : > { %v706_v36 = vrot.slane %v578_v34, 1  ;;  %v2071_v45 = vmax.f32 %v2039_v49, 0.0  ;;  %v1247_v22 = vadd.f32 %v1159_v28, %v1001_v8  ;;  %v952_v18 = vrot.slane %v825_v43, 1  ;;  %v2337_v35 = vpop.f32.mrf.mxu1 }
 0x13c   : > { %v1198_v31 = vrot.slane %v1071_v56, 1  ;;  %v524_v15 = vadd.f32 %v492_v20, %v454_v44  ;;  %v1445_v29 = vrot.slane %v1317_v48, 2  ;;  %v1564_v38 = vmul.f32 %v4556_v47, %v4523_v5 }
 0x13d   : > { %v707_v27 = vsel %vm627_vm0, %v704_v24, %v706_v36  ;;  %2665 = vmatprep.mubr.msk.f32.mxu1 %vm2084_vm2, %v2071_v45  ;;  %v1494_v3 = vadd.f32 %v1406_v32, %v1247_v22  ;;  %v953_v50 = vsel %vm627_vm0, %v950_v1, %v952_v18  ;;  %v1810_v39 = vmul.f32 %v4564_v37, %v304_v59 }
 0x13e   : > { %v1898_v25 = vsel %vm1366_vm1, %v1895_v52, %v1897_v10  ;;  %v771_v5 = vadd.f32 %v707_v27, %v524_v15  ;;  %v1199_v47 = vsel %vm627_vm0, %v1196_v2, %v1198_v31  ;;  %v2253_v42 = vadd.f32 %v2622_v9, %v4777_v7 }
 0x13f   : > { %v1740_v24 = vadd.f32 %v1652_v6, %v1494_v3  ;;  %v1691_v37 = vrot.slane %v1564_v38, 2  ;;  %v2333_v1 = vadd.f32 %v2646_v60, %v4777_v7  ;;  %v1446_v52 = vsel %vm1366_vm1, %v1443_v4, %v1445_v29 }
 0x140   : > { %v1017_v57 = vadd.f32 %v953_v50, %v771_v5  ;;  %2408 = vst.msk [vmem:[%s4792_s11 + $0x8] sm:$0xff] %vm2406_vm3, %v2253_v42  ;;  %v2248_v51 = vadd.f32 %v4777_v7, %v2247_v30  ;;  %v2328_v2 = vadd.f32 %v4777_v7, %v2327_v46  ;;  %v1937_v61 = vrot.slane %v1810_v39, 2 }
 0x141   : > { %v1986_v9 = vadd.f32 %v1898_v25, %v1740_v24  ;;  %2424 = vst.msk [vmem:[%s4792_s11 + $0x88] sm:$0xff] %vm2406_vm3, %v2333_v1  ;;  %v2263_v60 = vadd.f32 %v2625_v13, %v4777_v7  ;;  %v2343_v11 = vadd.f32 %v2649_v63, %v4777_v7  ;;  %v2258_v4 = vadd.f32 %v4777_v7, %v2257_v55 }
 0x142   : > { %v1263_v14 = vadd.f32 %v1199_v47, %v1017_v57  ;;  %2407 = vst.msk [vmem:[%s4792_s11] sm:$0xff] %vm2406_vm3, %v2248_v51  ;;  %2423 = vst.msk [vmem:[%s4792_s11 + $0x80] sm:$0xff] %vm2406_vm3, %v2328_v2  ;;  %v2338_v62 = vadd.f32 %v4777_v7, %v2337_v35  ;;  %v1692_v19 = vsel %vm1366_vm1, %v1689_v17, %v1691_v37 }
 0x143   : > { %v2024_v26 = vadd.f32 %v4608_v23, %v1986_v9  ;;  %2410 = vst.msk [vmem:[%s4792_s11 + $0x18] sm:$0xff] %vm2406_vm3, %v2263_v60  ;;  %2426 = vst.msk [vmem:[%s4792_s11 + $0x98] sm:$0xff] %vm2406_vm3, %v2343_v11  ;;  %v1938_v16 = vsel %vm1366_vm1, %v1935_v21, %v1937_v61 }
 0x144   : > { %v1510_v0 = vadd.f32 %v1446_v52, %v1263_v14  ;;  %2409 = vst.msk [vmem:[%s4792_s11 + $0x10] sm:$0xff] %vm2406_vm3, %v2258_v4  ;;  %2425 = vst.msk [vmem:[%s4792_s11 + $0x90] sm:$0xff] %vm2406_vm3, %v2338_v62 }
 0x145   : > { %v2056_v54 = vmax.f32 %v2024_v26, 0.0 }
 0x146   : > { %v1756_v41 = vadd.f32 %v1692_v19, %v1510_v0 }
 0x147   : > { %2642 = vmatmul.mubr.msk.f32.gmra.mxu0 %vm2084_vm2, %v2056_v54 }
 0x148   : > { %v2002_v17 = vadd.f32 %v1938_v16, %v1756_v41  ;;  %v2628_v20 = vpop.f32.mrf.mxu0 }
 0x149   : > { %v2273_v12 = vadd.f32 %v2628_v20, %v4777_v7 }
 0x14a   : > { %v2040_v59 = vadd.f32 %v4608_v23, %v2002_v17  ;;  %v2267_v33 = vpop.f32.mrf.mxu0 }
 0x14b   : > { %2412 = vst.msk [vmem:[%s4792_s11 + $0x28] sm:$0xff] %vm2406_vm3, %v2273_v12  ;;  %v2268_v53 = vadd.f32 %v4777_v7, %v2267_v33 }
 0x14c   : > { %v2072_v40 = vmax.f32 %v2040_v59, 0.0 }
 0x14d   : > { %2411 = vst.msk [vmem:[%s4792_s11 + $0x20] sm:$0xff] %vm2406_vm3, %v2268_v53 }
 0x14e   : > { %2666 = vmatmul.mubr.msk.f32.gmra.mxu1 %vm2084_vm2, %v2072_v40 }
 0x151   : > { %v2652_v21 = vpop.f32.mrf.mxu1 }
 0x152   : > { %v2353_v28 = vadd.f32 %v2652_v21, %v4777_v7 }
 0x153   : > { %v2347_v23 = vpop.f32.mrf.mxu1 }
 0x154   : > { %2428 = vst.msk [vmem:[%s4792_s11 + $0xa8] sm:$0xff] %vm2406_vm3, %v2353_v28  ;;  %v2348_v30 = vadd.f32 %v4777_v7, %v2347_v23 }
 0x156   : > { %2427 = vst.msk [vmem:[%s4792_s11 + $0xa0] sm:$0xff] %vm2406_vm3, %v2348_v30 }
 0x16f   : > { %v2631_v46 = vpop.f32.mrf.mxu0 }
 0x170   : > { %v2283_v32 = vadd.f32 %v2631_v46, %v4777_v7 }
 0x171   : > { %v2277_v6 = vpop.f32.mrf.mxu0 }
 0x172   : > { %2414 = vst.msk [vmem:[%s4792_s11 + $0x38] sm:$0xff] %vm2406_vm3, %v2283_v32  ;;  %v2278_v58 = vadd.f32 %v4777_v7, %v2277_v6 }
 0x174   : > { %2413 = vst.msk [vmem:[%s4792_s11 + $0x30] sm:$0xff] %vm2406_vm3, %v2278_v58 }
 0x177   : > { %v2655_v34 = vpop.f32.mrf.mxu1 }
 0x178   : > { %v2363_v49 = vadd.f32 %v2655_v34, %v4777_v7 }
 0x179   : > { %v2357_v8 = vpop.f32.mrf.mxu1 }
 0x17a   : > { %2430 = vst.msk [vmem:[%s4792_s11 + $0xb8] sm:$0xff] %vm2406_vm3, %v2363_v49  ;;  %v2358_v43 = vadd.f32 %v4777_v7, %v2357_v8 }
 0x17c   : > { %2429 = vst.msk [vmem:[%s4792_s11 + $0xb0] sm:$0xff] %vm2406_vm3, %v2358_v43 }
 0x195   : > { %v2634_v56 = vpop.f32.mrf.mxu0 }
 0x196   : > { %v2293_v10 = vadd.f32 %v2634_v56, %v4777_v7 }
 0x197   : > { %v2287_v44 = vpop.f32.mrf.mxu0 }
 0x198   : > { %2416 = vst.msk [vmem:[%s4792_s11 + $0x48] sm:$0xff] %vm2406_vm3, %v2293_v10  ;;  %v2288_v36 = vadd.f32 %v4777_v7, %v2287_v44 }
 0x19a   : > { %2415 = vst.msk [vmem:[%s4792_s11 + $0x40] sm:$0xff] %vm2406_vm3, %v2288_v36 }
 0x19d   : > { %v2658_v48 = vpop.f32.mrf.mxu1 }
 0x19e   : > { %v2373_v45 = vadd.f32 %v2658_v48, %v4777_v7 }
 0x19f   : > { %v2367_v22 = vpop.f32.mrf.mxu1 }
 0x1a0   : > { %2432 = vst.msk [vmem:[%s4792_s11 + $0xc8] sm:$0xff] %vm2406_vm3, %v2373_v45  ;;  %v2368_v18 = vadd.f32 %v4777_v7, %v2367_v22 }
 0x1a2   : > { %2431 = vst.msk [vmem:[%s4792_s11 + $0xc0] sm:$0xff] %vm2406_vm3, %v2368_v18 }
 0x1bc   : > { %v2637_v31 = vpop.f32.mrf.mxu0 }
 0x1bd   : > { %v2303_v13 = vadd.f32 %v2637_v31, %v4777_v7 }
 0x1be   : > { %v2297_v63 = vpop.f32.mrf.mxu0 }
 0x1bf   : > { %2418 = vst.msk [vmem:[%s4792_s11 + $0x58] sm:$0xff] %vm2406_vm3, %v2303_v13  ;;  %v2298_v15 = vadd.f32 %v4777_v7, %v2297_v63 }
 0x1c1   : > { %2417 = vst.msk [vmem:[%s4792_s11 + $0x50] sm:$0xff] %vm2406_vm3, %v2298_v15 }
 0x1c4   : > { %v2661_v27 = vpop.f32.mrf.mxu1 }
 0x1c5   : > { %v2383_v29 = vadd.f32 %v2661_v27, %v4777_v7 }
 0x1c6   : > { %v2377_v38 = vpop.f32.mrf.mxu1 }
 0x1c7   : > { %2434 = vst.msk [vmem:[%s4792_s11 + $0xd8] sm:$0xff] %vm2406_vm3, %v2383_v29  ;;  %v2378_v3 = vadd.f32 %v4777_v7, %v2377_v38 }
 0x1c9   : > { %2433 = vst.msk [vmem:[%s4792_s11 + $0xd0] sm:$0xff] %vm2406_vm3, %v2378_v3 }
 0x1e2   : > { %v2640_v50 = vpop.f32.mrf.mxu0 }
 0x1e3   : > { %v2313_v39 = vadd.f32 %v2640_v50, %v4777_v7 }
 0x1e4   : > { %v2307_v25 = vpop.f32.mrf.mxu0 }
 0x1e5   : > { %2420 = vst.msk [vmem:[%s4792_s11 + $0x68] sm:$0xff] %vm2406_vm3, %v2313_v39  ;;  %v2308_v5 = vadd.f32 %v4777_v7, %v2307_v25 }
 0x1e7   : > { %2419 = vst.msk [vmem:[%s4792_s11 + $0x60] sm:$0xff] %vm2406_vm3, %v2308_v5 }
 0x1ea   : > { %v2664_v47 = vpop.f32.mrf.mxu1 }
 0x1eb   : > { %v2393_v42 = vadd.f32 %v2664_v47, %v4777_v7 }
 0x1ec   : > { %v2387_v24 = vpop.f32.mrf.mxu1 }
 0x1ed   : > { %2436 = vst.msk [vmem:[%s4792_s11 + $0xe8] sm:$0xff] %vm2406_vm3, %v2393_v42  ;;  %v2388_v37 = vadd.f32 %v4777_v7, %v2387_v24 }
 0x1ef   : > { %2435 = vst.msk [vmem:[%s4792_s11 + $0xe0] sm:$0xff] %vm2406_vm3, %v2388_v37 }
 0x207   : > { %v2643_v1 = vpop.f32.mrf.mxu0 }
 0x208   : > { %v2323_v55 = vadd.f32 %v2643_v1, %v4777_v7 }
 0x209   : > { %v2317_v35 = vpop.f32.mrf.mxu0 }
 0x20a   : > { %2422 = vst.msk [vmem:[%s4792_s11 + $0x78] sm:$0xff] %vm2406_vm3, %v2323_v55  ;;  %v2318_v57 = vadd.f32 %v4777_v7, %v2317_v35 }
 0x20c   : > { %2421 = vst.msk [vmem:[%s4792_s11 + $0x70] sm:$0xff] %vm2406_vm3, %v2318_v57 }
 0x20e   : > { %v2667_v52 = vpop.f32.mrf.mxu1 }
 0x20f   : > { %v2403_v51 = vadd.f32 %v2667_v52, %v4777_v7 }
 0x210   : > { %v2397_v2 = vpop.f32.mrf.mxu1 }
 0x211   : > { %2438 = vst.msk [vmem:[%s4792_s11 + $0xf8] sm:$0xff] %vm2406_vm3, %v2403_v51  ;;  %v2398_v9 = vadd.f32 %v4777_v7, %v2397_v2 }
 0x213   : > { %2437 = vst.msk [vmem:[%s4792_s11 + $0xf0] sm:$0xff] %vm2406_vm3, %v2398_v9 }
 0x214 PF: > { %s15_s20 = sadd.s32 1, %s2749_s20   ;;  %s4996_s18 = smov %s2745_s19 }
 0x215   : > { %p12_p5 = scmp.ge.s32.totalorder %s15_s20, 4   ;;  %s4997_s19 = smov %s4999_s21 }
 0x217   :  { %14 = sbr.rel (!%p12_p5) target bundleno = 2 (0x2), region = 71 }

</bundles_post_ra>
